<compile_context>
chip_gen: v6e
topology: v6e:2x2x1
jax: 0.10.0
libtpu: 0.0.40
codegen_flags: <defaults>
</compile_context>

<pallas_src>
import functools
import numpy as np
import jax
import jax.numpy as jnp
from jax.experimental import pallas as pl
from jax.experimental.pallas import tpu as pltpu

_BN_EPS = 1e-5


# ------------------------------------------------------------------ static layer metadata

def decoder_layer_configs(in_c, hidden_c, latent_c):
    # (Cin, Cout, K, stride, pad, use_bn, act) — mirrors Decoder.__init__
    return [
        (latent_c,      hidden_c * 16, 10, 1, 0, True,  "relu"),
        (hidden_c * 16, hidden_c * 8,  4,  2, 1, True,  "relu"),
        (hidden_c * 8,  hidden_c * 4,  4,  2, 1, True,  "relu"),
        (hidden_c * 4,  hidden_c * 2,  4,  2, 1, True,  "relu"),
        (hidden_c * 2,  hidden_c * 1,  4,  2, 1, True,  "relu"),
        (hidden_c,      in_c,          4,  2, 1, False, "tanh"),
    ]


def _poly_placement(K, stride, pad, n_phase):
    """0/1 placement S[k, in_block, out_phase_block] for a polyphase ConvTranspose layer.

    Input lhs column blocks (width Cin each):
        block 0            : x[l-1] halo (phase n_phase-1 of row q-1)
        block 1..n_phase   : phases 0..n_phase-1 of row q
        block n_phase+1    : x[l+1] halo (phase 0 of row q+1)
    Output column blocks (width Cout each): new phase = stride*ph + r.
    """
    B, P = n_phase + 2, stride * n_phase
    S = np.zeros((K, B, P), np.float32)
    for r in range(stride):
        for k in range(K):
            if (r + pad - k) % stride != 0:
                continue
            d = (r + pad - k) // stride          # source index = l + d
            assert -1 <= d <= 1, "tap reach exceeds the one-phase halo"
            for ph in range(n_phase):
                src = ph + d
                if src < -1 or src > n_phase:
                    continue
                b = 0 if src == -1 else (n_phase + 1 if src == n_phase else 1 + src)
                S[k, b, stride * ph + r] = 1.0
    return S


# ------------------------------------------------------------------ fused kernel

def _decoder_fused_kernel(*refs, meta, n_batch, q_rows):
    """refs = (lhs0, w0, g0, b0, w1, g1, b1, ..., w4, g4, b4, w5, out).

    lhs0 : (N*Q, K0*Cin0)  im2col of the stride-1 first ConvTranspose (built in the wrapper)
    w_i  : polyphase-packed weight (see _poly_placement)
    g_i/b_i : (1, Cout_i) BatchNorm affine (only for BN layers)
    out  : (N*Q, n_phase_final*C_final) polyphase output tile
    """
    lhs0_ref, o_ref = refs[0], refs[-1]
    prm = refs[1:-1]
    f32 = jnp.float32
    NQ = n_batch * q_rows

    def bn_train(y, gamma, beta, n_phase, cout):
        """PyTorch BatchNorm1d train-mode (biased batch stats) on a phase-packed tile."""
        count = float(NQ * n_phase)
        col_sum = jnp.sum(y, axis=0, keepdims=True)               # (1, n_phase*cout)
        ch_sum = col_sum[:, :cout]
        for ph in range(1, n_phase):                              # exact f32 phase fold
            ch_sum = ch_sum + col_sum[:, ph * cout:(ph + 1) * cout]
        mean = ch_sum * (1.0 / count)                             # (1, cout)
        mean_w = mean if n_phase == 1 else jnp.concatenate([mean] * n_phase, axis=1)
        yc = y - mean_w                                           # two-pass: no E[x^2]-E[x]^2 cancel
        col_sq = jnp.sum(yc * yc, axis=0, keepdims=True)
        ch_sq = col_sq[:, :cout]
        for ph in range(1, n_phase):
            ch_sq = ch_sq + col_sq[:, ph * cout:(ph + 1) * cout]
        var = ch_sq * (1.0 / count)
        scale = gamma * jax.lax.rsqrt(var + _BN_EPS)              # (1, cout)
        scale_w = scale if n_phase == 1 else jnp.concatenate([scale] * n_phase, axis=1)
        beta_w = beta if n_phase == 1 else jnp.concatenate([beta] * n_phase, axis=1)
        return yc * scale_w + beta_w

    def activate(y, act):
        return jnp.maximum(y, 0.0) if act == "relu" else jnp.tanh(y)

    # ---- layer 0 (stride-1 ConvTranspose): one MXU matmul over the wrapper-built im2col ----
    pi = 0
    m0 = meta[0]
    y = jnp.dot(lhs0_ref[...], prm[pi][...], preferred_element_type=f32)   # (NQ, Cout0)
    pi += 1
    if m0["use_bn"]:
        y = bn_train(y, prm[pi][...], prm[pi + 1][...], 1, m0["cout"])
        pi += 2
    y = activate(y, m0["act"])

    # ---- layers 1..: polyphase stride-s ConvTranspose, ONE matmul per layer ----
    for li in range(1, len(meta)):
        m = meta[li]
        cin, cout, npi, s = m["cin"], m["cout"], m["n_phase_in"], m["stride"]
        last_blk = y[:, (npi - 1) * cin:]                         # phase n_phase-1 columns
        first_blk = y[:, :cin]                                    # phase 0 columns
        zrow = jnp.zeros((1, cin), f32)
        prev_pieces, next_pieces = [], []
        for n in range(n_batch):                                  # +/-1 row halo, per batch (exact zeros)
            prev_pieces += [zrow, last_blk[n * q_rows:(n + 1) * q_rows - 1, :]]
            next_pieces += [first_blk[n * q_rows + 1:(n + 1) * q_rows, :], zrow]
        prev_blk = jnp.concatenate(prev_pieces, axis=0)           # x[l-1] block
        next_blk = jnp.concatenate(next_pieces, axis=0)           # x[l+1] block
        lhs = jnp.concatenate([prev_blk, y, next_blk], axis=1)    # (NQ, (n_phase+2)*cin)
        y = jnp.dot(lhs, prm[pi][...], preferred_element_type=f32)  # (NQ, s*n_phase*cout)
        pi += 1
        if m["use_bn"]:
            y = bn_train(y, prm[pi][...], prm[pi + 1][...], s * npi, cout)
            pi += 2
        y = activate(y, m["act"])

    o_ref[...] = y


# ------------------------------------------------------------------ wrapper / params / ref

@functools.partial(jax.jit, static_argnames=("in_c", "hidden_c", "latent_c"))
def decoder_forward(params, x_ncl, *, in_c, hidden_c, latent_c):
    """x_ncl: (N, latent_c, L) PyTorch NCL layout -> (N, in_c, L_out) NCL."""
    configs = decoder_layer_configs(in_c, hidden_c, latent_c)
    N, _, L_in = x_ncl.shape
    c0i, c0o, K0, s0, p0, bn0, act0 = configs[0]
    assert s0 == 1 and p0 == 0
    Q = L_in + K0 - 1                     # output length of layer 0 = row count for all layers
    f32 = jnp.float32

    # layer-0 im2col (stride-1 transposed conv): y0[o] = sum_k x[o-k] @ W_k
    x_nlc = jnp.transpose(x_ncl, (0, 2, 1)).astype(f32)            # (N, L_in, Cin0)
    cols = [jnp.pad(x_nlc, ((0, 0), (k, Q - k - L_in), (0, 0))) for k in range(K0)]
    lhs0 = jnp.concatenate(cols, axis=-1).reshape(N * Q, K0 * c0i)

    w0 = params[0]["w"].astype(f32)                                # (Cin0, Cout0, K0)
    inputs = [lhs0,
              jnp.transpose(w0, (2, 0, 1)).reshape(K0 * c0i, c0o),
              params[0]["gamma"].astype(f32).reshape(1, c0o),
              params[0]["beta"].astype(f32).reshape(1, c0o)]
    meta = [dict(cout=c0o, use_bn=bn0, act=act0)]

    n_phase = 1
    for li in range(1, len(configs)):
        cin, cout, K, s, p, use_bn, act = configs[li]
        assert K == 2 * p + s and p <= s, "layer must tile output length by stride"
        S = _poly_placement(K, s, p, n_phase)                      # (K, n_phase+2, s*n_phase)
        wt = jnp.transpose(params[li]["w"].astype(f32), (2, 0, 1)) # (K, cin, cout)
        # exact (elementwise) block placement of taps into the packed weight
        wp = (wt[:, None, :, None, :] * jnp.asarray(S)[:, :, None, :, None]).sum(axis=0)
        wp = wp.reshape((n_phase + 2) * cin, s * n_phase * cout)
        inputs.append(wp)
        if use_bn:
            inputs.append(params[li]["gamma"].astype(f32).reshape(1, cout))
            inputs.append(params[li]["beta"].astype(f32).reshape(1, cout))
        meta.append(dict(cin=cin, cout=cout, n_phase_in=n_phase, stride=s,
                         use_bn=use_bn, act=act))
        n_phase *= s

    C_fin = configs[-1][1]
    # Gridless: full working set (packed weights + activations) is well under 1 MiB of VMEM.
    out_flat = pl.pallas_call(
        functools.partial(_decoder_fused_kernel, meta=tuple(meta), n_batch=N, q_rows=Q),
        out_shape=jax.ShapeDtypeStruct((N * Q, n_phase * C_fin), f32),
        in_specs=[pl.BlockSpec(memory_space=pltpu.MemorySpace.VMEM)] * len(inputs),
        out_specs=pl.BlockSpec(memory_space=pltpu.MemorySpace.VMEM),
    )(*inputs)

    # polyphase (N*Q, n_phase*C) -> NCL (N, C, n_phase*Q): tiny (~15 KB) XLA layout op.
    out = out_flat.reshape(N, Q, n_phase, C_fin)
    return jnp.transpose(out, (0, 3, 1, 2)).reshape(N, C_fin, Q * n_phase)


def init_decoder_params(key, in_c, hidden_c, latent_c):
    params = []
    for (cin, cout, k, _s, _p, use_bn, _a) in decoder_layer_configs(in_c, hidden_c, latent_c):
        key, kw, kg, kb = jax.random.split(key, 4)
        w = jax.random.normal(kw, (cin, cout, k), jnp.float32) / np.sqrt(cin * k)
        if use_bn:
            gamma = 1.0 + 0.1 * jax.random.normal(kg, (cout,), jnp.float32)
            beta = 0.1 * jax.random.normal(kb, (cout,), jnp.float32)
        else:
            gamma = jnp.ones((cout,), jnp.float32)
            beta = jnp.zeros((cout,), jnp.float32)
        params.append(dict(w=w, gamma=gamma, beta=beta))
    return params


def _ref_forward(params, x_ncl, in_c, hidden_c, latent_c):
    """Pure-numpy reference of the PyTorch forward (train-mode BN)."""
    x = np.transpose(np.asarray(x_ncl, np.float32), (0, 2, 1))
    for p, (_ci, cout, k, stride, pad, use_bn, act) in zip(
            params, decoder_layer_configs(in_c, hidden_c, latent_c)):
        w = np.asarray(p["w"])                                     # (Cin, Cout, K)
        N, L, _ = x.shape
        L_out = (L - 1) * stride - 2 * pad + k
        y = np.zeros((N, L_out, cout), np.float32)
        for l in range(L):
            for kk in range(k):
                o = l * stride - pad + kk
                if 0 <= o < L_out:
                    y[:, o, :] += x[:, l, :] @ w[:, :, kk]
        if use_bn:
            mean = y.mean(axis=(0, 1))
            var = y.var(axis=(0, 1))
            y = (y - mean) / np.sqrt(var + _BN_EPS) * np.asarray(p["gamma"]) + np.asarray(p["beta"])
        if act == "relu":
            y = np.maximum(y, 0.0)
        elif act == "tanh":
            y = np.tanh(y)
        x = y
    return np.transpose(x, (0, 2, 1))


if __name__ == "__main__":
    in_c, hidden_c, latent_c = 6, 4, 8
    N, L_in = 2, 1   # latent feature (N, latent_c, 1), as produced by the BeatGAN encoder

    key = jax.random.PRNGKey(0)
    kp, kx = jax.random.split(key)
    params = init_decoder_params(kp, in_c, hidden_c, latent_c)
    x = jax.random.normal(kx, (N, latent_c, L_in), jnp.float32)    # PyTorch NCL layout

    out = decoder_forward(params, x, in_c=in_c, hidden_c=hidden_c, latent_c=latent_c)
    out = jax.block_until_ready(out)
    assert out.shape == (N, in_c, 320), out.shape

    ref = _ref_forward(params, x, in_c, hidden_c, latent_c)
    # Default-precision MXU matmuls (bf16 operand rounding, f32 accumulation) -> 2e-2 tol.
    np.testing.assert_allclose(np.asarray(out), ref, rtol=2e-2, atol=2e-2)
    print("KERNEL_OK")
</pallas_src>

<mosaic_0001>
module attributes {stable_mosaic.version = 11 : i64} {
  func.func @_decoder_fused_kernel(%arg0: memref<20x80xf32, #tpu.memory_space<vmem>>, %arg1: memref<80x64xf32, #tpu.memory_space<vmem>>, %arg2: memref<1x64xf32, #tpu.memory_space<vmem>>, %arg3: memref<1x64xf32, #tpu.memory_space<vmem>>, %arg4: memref<192x64xf32, #tpu.memory_space<vmem>>, %arg5: memref<1x32xf32, #tpu.memory_space<vmem>>, %arg6: memref<1x32xf32, #tpu.memory_space<vmem>>, %arg7: memref<128x64xf32, #tpu.memory_space<vmem>>, %arg8: memref<1x16xf32, #tpu.memory_space<vmem>>, %arg9: memref<1x16xf32, #tpu.memory_space<vmem>>, %arg10: memref<96x64xf32, #tpu.memory_space<vmem>>, %arg11: memref<1x8xf32, #tpu.memory_space<vmem>>, %arg12: memref<1x8xf32, #tpu.memory_space<vmem>>, %arg13: memref<80x64xf32, #tpu.memory_space<vmem>>, %arg14: memref<1x4xf32, #tpu.memory_space<vmem>>, %arg15: memref<1x4xf32, #tpu.memory_space<vmem>>, %arg16: memref<72x192xf32, #tpu.memory_space<vmem>>, %arg17: memref<20x192xf32, #tpu.memory_space<vmem>>) attributes {dimension_semantics = [], scalar_prefetch = 0 : i64, scratch_operands = 0 : i64, tpu.core_type = #tpu.core_type<tc>} {
    %c0 = arith.constant 0 : index
    %c0_0 = arith.constant 0 : index
    %0 = vector.load %arg0[%c0, %c0_0] : memref<20x80xf32, #tpu.memory_space<vmem>>, vector<20x80xf32>
    %c0_1 = arith.constant 0 : index
    %c0_2 = arith.constant 0 : index
    %1 = vector.load %arg1[%c0_1, %c0_2] : memref<80x64xf32, #tpu.memory_space<vmem>>, vector<80x64xf32>
    %cst = arith.constant dense<0.000000e+00> : vector<20x64xf32>
    %2 = tpu.matmul %0, %1, %cst {dimension_numbers = #tpu.dot_dimension_numbers<[1], [0], [0], [1], [0, 0, 1, 1], [], []>} : vector<20x80xf32>, vector<80x64xf32>, vector<20x64xf32> -> vector<20x64xf32>
    %c0_3 = arith.constant 0 : index
    %c0_4 = arith.constant 0 : index
    %3 = vector.load %arg2[%c0_3, %c0_4] : memref<1x64xf32, #tpu.memory_space<vmem>>, vector<1x64xf32>
    %c0_5 = arith.constant 0 : index
    %c0_6 = arith.constant 0 : index
    %4 = vector.load %arg3[%c0_5, %c0_6] : memref<1x64xf32, #tpu.memory_space<vmem>>, vector<1x64xf32>
    %cst_7 = arith.constant dense<0.000000e+00> : vector<64xf32>
    %5 = vector.multi_reduction <add>, %2, %cst_7 [0] : vector<20x64xf32> to vector<64xf32>
    %6 = vector.shape_cast %5 : vector<64xf32> to vector<1x64xf32>
    %cst_8 = arith.constant 5.000000e-02 : f32
    %7 = vector.broadcast %cst_8 : f32 to vector<1x64xf32>
    %8 = arith.mulf %6, %7 : vector<1x64xf32>
    %9 = vector.broadcast %8 : vector<1x64xf32> to vector<20x64xf32>
    %10 = arith.subf %2, %9 : vector<20x64xf32>
    %11 = arith.mulf %10, %10 : vector<20x64xf32>
    %cst_9 = arith.constant dense<0.000000e+00> : vector<64xf32>
    %12 = vector.multi_reduction <add>, %11, %cst_9 [0] : vector<20x64xf32> to vector<64xf32>
    %13 = vector.shape_cast %12 : vector<64xf32> to vector<1x64xf32>
    %cst_10 = arith.constant 5.000000e-02 : f32
    %14 = vector.broadcast %cst_10 : f32 to vector<1x64xf32>
    %15 = arith.mulf %13, %14 : vector<1x64xf32>
    %cst_11 = arith.constant 9.99999974E-6 : f32
    %16 = vector.broadcast %cst_11 : f32 to vector<1x64xf32>
    %17 = arith.addf %15, %16 : vector<1x64xf32>
    %18 = math.rsqrt %17 : vector<1x64xf32>
    %19 = arith.mulf %3, %18 : vector<1x64xf32>
    %20 = vector.broadcast %19 : vector<1x64xf32> to vector<20x64xf32>
    %21 = arith.mulf %10, %20 : vector<20x64xf32>
    %22 = vector.broadcast %4 : vector<1x64xf32> to vector<20x64xf32>
    %23 = arith.addf %21, %22 : vector<20x64xf32>
    %cst_12 = arith.constant 0.000000e+00 : f32
    %24 = vector.broadcast %cst_12 : f32 to vector<20x64xf32>
    %25 = arith.maximumf %23, %24 : vector<20x64xf32>
    %cst_13 = arith.constant 0.000000e+00 : f32
    %26 = vector.broadcast %cst_13 : f32 to vector<1x64xf32>
    %27 = vector.extract_strided_slice %25 {offsets = [0, 0], sizes = [9, 64], strides = [1, 1]} : vector<20x64xf32> to vector<9x64xf32>
    %28 = vector.extract_strided_slice %25 {offsets = [1, 0], sizes = [9, 64], strides = [1, 1]} : vector<20x64xf32> to vector<9x64xf32>
    %29 = vector.extract_strided_slice %25 {offsets = [10, 0], sizes = [9, 64], strides = [1, 1]} : vector<20x64xf32> to vector<9x64xf32>
    %30 = vector.extract_strided_slice %25 {offsets = [11, 0], sizes = [9, 64], strides = [1, 1]} : vector<20x64xf32> to vector<9x64xf32>
    %31 = tpu.concatenate %26, %27, %26, %29 in 0 : vector<1x64xf32>, vector<9x64xf32>, vector<1x64xf32>, vector<9x64xf32> -> vector<20x64xf32>
    %32 = tpu.concatenate %28, %26, %30, %26 in 0 : vector<9x64xf32>, vector<1x64xf32>, vector<9x64xf32>, vector<1x64xf32> -> vector<20x64xf32>
    %33 = tpu.concatenate %31, %25, %32 in 1 : vector<20x64xf32>, vector<20x64xf32>, vector<20x64xf32> -> vector<20x192xf32>
    %c0_14 = arith.constant 0 : index
    %c0_15 = arith.constant 0 : index
    %34 = vector.load %arg4[%c0_14, %c0_15] : memref<192x64xf32, #tpu.memory_space<vmem>>, vector<192x64xf32>
    %cst_16 = arith.constant dense<0.000000e+00> : vector<20x64xf32>
    %35 = tpu.matmul %33, %34, %cst_16 {dimension_numbers = #tpu.dot_dimension_numbers<[1], [0], [0], [1], [0, 0, 1, 1], [], []>} : vector<20x192xf32>, vector<192x64xf32>, vector<20x64xf32> -> vector<20x64xf32>
    %c0_17 = arith.constant 0 : index
    %c0_18 = arith.constant 0 : index
    %36 = vector.load %arg5[%c0_17, %c0_18] : memref<1x32xf32, #tpu.memory_space<vmem>>, vector<1x32xf32>
    %c0_19 = arith.constant 0 : index
    %c0_20 = arith.constant 0 : index
    %37 = vector.load %arg6[%c0_19, %c0_20] : memref<1x32xf32, #tpu.memory_space<vmem>>, vector<1x32xf32>
    %cst_21 = arith.constant dense<0.000000e+00> : vector<64xf32>
    %38 = vector.multi_reduction <add>, %35, %cst_21 [0] : vector<20x64xf32> to vector<64xf32>
    %39 = vector.shape_cast %38 : vector<64xf32> to vector<1x64xf32>
    %40 = vector.extract_strided_slice %39 {offsets = [0, 0], sizes = [1, 32], strides = [1, 1]} : vector<1x64xf32> to vector<1x32xf32>
    %41 = vector.extract_strided_slice %39 {offsets = [0, 32], sizes = [1, 32], strides = [1, 1]} : vector<1x64xf32> to vector<1x32xf32>
    %42 = arith.addf %40, %41 : vector<1x32xf32>
    %cst_22 = arith.constant 2.500000e-02 : f32
    %43 = vector.broadcast %cst_22 : f32 to vector<1x32xf32>
    %44 = arith.mulf %42, %43 : vector<1x32xf32>
    %45 = tpu.concatenate %44, %44 in 1 : vector<1x32xf32>, vector<1x32xf32> -> vector<1x64xf32>
    %46 = vector.broadcast %45 : vector<1x64xf32> to vector<20x64xf32>
    %47 = arith.subf %35, %46 : vector<20x64xf32>
    %48 = arith.mulf %47, %47 : vector<20x64xf32>
    %cst_23 = arith.constant dense<0.000000e+00> : vector<64xf32>
    %49 = vector.multi_reduction <add>, %48, %cst_23 [0] : vector<20x64xf32> to vector<64xf32>
    %50 = vector.shape_cast %49 : vector<64xf32> to vector<1x64xf32>
    %51 = vector.extract_strided_slice %50 {offsets = [0, 0], sizes = [1, 32], strides = [1, 1]} : vector<1x64xf32> to vector<1x32xf32>
    %52 = vector.extract_strided_slice %50 {offsets = [0, 32], sizes = [1, 32], strides = [1, 1]} : vector<1x64xf32> to vector<1x32xf32>
    %53 = arith.addf %51, %52 : vector<1x32xf32>
    %cst_24 = arith.constant 2.500000e-02 : f32
    %54 = vector.broadcast %cst_24 : f32 to vector<1x32xf32>
    %55 = arith.mulf %53, %54 : vector<1x32xf32>
    %cst_25 = arith.constant 9.99999974E-6 : f32
    %56 = vector.broadcast %cst_25 : f32 to vector<1x32xf32>
    %57 = arith.addf %55, %56 : vector<1x32xf32>
    %58 = math.rsqrt %57 : vector<1x32xf32>
    %59 = arith.mulf %36, %58 : vector<1x32xf32>
    %60 = tpu.concatenate %59, %59 in 1 : vector<1x32xf32>, vector<1x32xf32> -> vector<1x64xf32>
    %61 = tpu.concatenate %37, %37 in 1 : vector<1x32xf32>, vector<1x32xf32> -> vector<1x64xf32>
    %62 = vector.broadcast %60 : vector<1x64xf32> to vector<20x64xf32>
    %63 = arith.mulf %47, %62 : vector<20x64xf32>
    %64 = vector.broadcast %61 : vector<1x64xf32> to vector<20x64xf32>
    %65 = arith.addf %63, %64 : vector<20x64xf32>
    %cst_26 = arith.constant 0.000000e+00 : f32
    %66 = vector.broadcast %cst_26 : f32 to vector<20x64xf32>
    %67 = arith.maximumf %65, %66 : vector<20x64xf32>
    %68 = vector.extract_strided_slice %67 {offsets = [0, 32], sizes = [20, 32], strides = [1, 1]} : vector<20x64xf32> to vector<20x32xf32>
    %69 = vector.extract_strided_slice %67 {offsets = [0, 0], sizes = [20, 32], strides = [1, 1]} : vector<20x64xf32> to vector<20x32xf32>
    %cst_27 = arith.constant 0.000000e+00 : f32
    %70 = vector.broadcast %cst_27 : f32 to vector<1x32xf32>
    %71 = vector.extract_strided_slice %68 {offsets = [0, 0], sizes = [9, 32], strides = [1, 1]} : vector<20x32xf32> to vector<9x32xf32>
    %72 = vector.extract_strided_slice %69 {offsets = [1, 0], sizes = [9, 32], strides = [1, 1]} : vector<20x32xf32> to vector<9x32xf32>
    %73 = vector.extract_strided_slice %68 {offsets = [10, 0], sizes = [9, 32], strides = [1, 1]} : vector<20x32xf32> to vector<9x32xf32>
    %74 = vector.extract_strided_slice %69 {offsets = [11, 0], sizes = [9, 32], strides = [1, 1]} : vector<20x32xf32> to vector<9x32xf32>
    %75 = tpu.concatenate %70, %71, %70, %73 in 0 : vector<1x32xf32>, vector<9x32xf32>, vector<1x32xf32>, vector<9x32xf32> -> vector<20x32xf32>
    %76 = tpu.concatenate %72, %70, %74, %70 in 0 : vector<9x32xf32>, vector<1x32xf32>, vector<9x32xf32>, vector<1x32xf32> -> vector<20x32xf32>
    %77 = tpu.concatenate %75, %67, %76 in 1 : vector<20x32xf32>, vector<20x64xf32>, vector<20x32xf32> -> vector<20x128xf32>
    %c0_28 = arith.constant 0 : index
    %c0_29 = arith.constant 0 : index
    %78 = vector.load %arg7[%c0_28, %c0_29] : memref<128x64xf32, #tpu.memory_space<vmem>>, vector<128x64xf32>
    %cst_30 = arith.constant dense<0.000000e+00> : vector<20x64xf32>
    %79 = tpu.matmul %77, %78, %cst_30 {dimension_numbers = #tpu.dot_dimension_numbers<[1], [0], [0], [1], [0, 0, 1, 1], [], []>} : vector<20x128xf32>, vector<128x64xf32>, vector<20x64xf32> -> vector<20x64xf32>
    %c0_31 = arith.constant 0 : index
    %c0_32 = arith.constant 0 : index
    %80 = vector.load %arg8[%c0_31, %c0_32] : memref<1x16xf32, #tpu.memory_space<vmem>>, vector<1x16xf32>
    %c0_33 = arith.constant 0 : index
    %c0_34 = arith.constant 0 : index
    %81 = vector.load %arg9[%c0_33, %c0_34] : memref<1x16xf32, #tpu.memory_space<vmem>>, vector<1x16xf32>
    %cst_35 = arith.constant dense<0.000000e+00> : vector<64xf32>
    %82 = vector.multi_reduction <add>, %79, %cst_35 [0] : vector<20x64xf32> to vector<64xf32>
    %83 = vector.shape_cast %82 : vector<64xf32> to vector<1x64xf32>
    %84 = vector.extract_strided_slice %83 {offsets = [0, 0], sizes = [1, 16], strides = [1, 1]} : vector<1x64xf32> to vector<1x16xf32>
    %85 = vector.extract_strided_slice %83 {offsets = [0, 16], sizes = [1, 16], strides = [1, 1]} : vector<1x64xf32> to vector<1x16xf32>
    %86 = arith.addf %84, %85 : vector<1x16xf32>
    %87 = vector.extract_strided_slice %83 {offsets = [0, 32], sizes = [1, 16], strides = [1, 1]} : vector<1x64xf32> to vector<1x16xf32>
    %88 = arith.addf %86, %87 : vector<1x16xf32>
    %89 = vector.extract_strided_slice %83 {offsets = [0, 48], sizes = [1, 16], strides = [1, 1]} : vector<1x64xf32> to vector<1x16xf32>
    %90 = arith.addf %88, %89 : vector<1x16xf32>
    %cst_36 = arith.constant 1.250000e-02 : f32
    %91 = vector.broadcast %cst_36 : f32 to vector<1x16xf32>
    %92 = arith.mulf %90, %91 : vector<1x16xf32>
    %93 = tpu.concatenate %92, %92, %92, %92 in 1 : vector<1x16xf32>, vector<1x16xf32>, vector<1x16xf32>, vector<1x16xf32> -> vector<1x64xf32>
    %94 = vector.broadcast %93 : vector<1x64xf32> to vector<20x64xf32>
    %95 = arith.subf %79, %94 : vector<20x64xf32>
    %96 = arith.mulf %95, %95 : vector<20x64xf32>
    %cst_37 = arith.constant dense<0.000000e+00> : vector<64xf32>
    %97 = vector.multi_reduction <add>, %96, %cst_37 [0] : vector<20x64xf32> to vector<64xf32>
    %98 = vector.shape_cast %97 : vector<64xf32> to vector<1x64xf32>
    %99 = vector.extract_strided_slice %98 {offsets = [0, 0], sizes = [1, 16], strides = [1, 1]} : vector<1x64xf32> to vector<1x16xf32>
    %100 = vector.extract_strided_slice %98 {offsets = [0, 16], sizes = [1, 16], strides = [1, 1]} : vector<1x64xf32> to vector<1x16xf32>
    %101 = arith.addf %99, %100 : vector<1x16xf32>
    %102 = vector.extract_strided_slice %98 {offsets = [0, 32], sizes = [1, 16], strides = [1, 1]} : vector<1x64xf32> to vector<1x16xf32>
    %103 = arith.addf %101, %102 : vector<1x16xf32>
    %104 = vector.extract_strided_slice %98 {offsets = [0, 48], sizes = [1, 16], strides = [1, 1]} : vector<1x64xf32> to vector<1x16xf32>
    %105 = arith.addf %103, %104 : vector<1x16xf32>
    %cst_38 = arith.constant 1.250000e-02 : f32
    %106 = vector.broadcast %cst_38 : f32 to vector<1x16xf32>
    %107 = arith.mulf %105, %106 : vector<1x16xf32>
    %cst_39 = arith.constant 9.99999974E-6 : f32
    %108 = vector.broadcast %cst_39 : f32 to vector<1x16xf32>
    %109 = arith.addf %107, %108 : vector<1x16xf32>
    %110 = math.rsqrt %109 : vector<1x16xf32>
    %111 = arith.mulf %80, %110 : vector<1x16xf32>
    %112 = tpu.concatenate %111, %111, %111, %111 in 1 : vector<1x16xf32>, vector<1x16xf32>, vector<1x16xf32>, vector<1x16xf32> -> vector<1x64xf32>
    %113 = tpu.concatenate %81, %81, %81, %81 in 1 : vector<1x16xf32>, vector<1x16xf32>, vector<1x16xf32>, vector<1x16xf32> -> vector<1x64xf32>
    %114 = vector.broadcast %112 : vector<1x64xf32> to vector<20x64xf32>
    %115 = arith.mulf %95, %114 : vector<20x64xf32>
    %116 = vector.broadcast %113 : vector<1x64xf32> to vector<20x64xf32>
    %117 = arith.addf %115, %116 : vector<20x64xf32>
    %cst_40 = arith.constant 0.000000e+00 : f32
    %118 = vector.broadcast %cst_40 : f32 to vector<20x64xf32>
    %119 = arith.maximumf %117, %118 : vector<20x64xf32>
    %120 = vector.extract_strided_slice %119 {offsets = [0, 48], sizes = [20, 16], strides = [1, 1]} : vector<20x64xf32> to vector<20x16xf32>
    %121 = vector.extract_strided_slice %119 {offsets = [0, 0], sizes = [20, 16], strides = [1, 1]} : vector<20x64xf32> to vector<20x16xf32>
    %cst_41 = arith.constant 0.000000e+00 : f32
    %122 = vector.broadcast %cst_41 : f32 to vector<1x16xf32>
    %123 = vector.extract_strided_slice %120 {offsets = [0, 0], sizes = [9, 16], strides = [1, 1]} : vector<20x16xf32> to vector<9x16xf32>
    %124 = vector.extract_strided_slice %121 {offsets = [1, 0], sizes = [9, 16], strides = [1, 1]} : vector<20x16xf32> to vector<9x16xf32>
    %125 = vector.extract_strided_slice %120 {offsets = [10, 0], sizes = [9, 16], strides = [1, 1]} : vector<20x16xf32> to vector<9x16xf32>
    %126 = vector.extract_strided_slice %121 {offsets = [11, 0], sizes = [9, 16], strides = [1, 1]} : vector<20x16xf32> to vector<9x16xf32>
    %127 = tpu.concatenate %122, %123, %122, %125 in 0 : vector<1x16xf32>, vector<9x16xf32>, vector<1x16xf32>, vector<9x16xf32> -> vector<20x16xf32>
    %128 = tpu.concatenate %124, %122, %126, %122 in 0 : vector<9x16xf32>, vector<1x16xf32>, vector<9x16xf32>, vector<1x16xf32> -> vector<20x16xf32>
    %129 = tpu.concatenate %127, %119, %128 in 1 : vector<20x16xf32>, vector<20x64xf32>, vector<20x16xf32> -> vector<20x96xf32>
    %c0_42 = arith.constant 0 : index
    %c0_43 = arith.constant 0 : index
    %130 = vector.load %arg10[%c0_42, %c0_43] : memref<96x64xf32, #tpu.memory_space<vmem>>, vector<96x64xf32>
    %cst_44 = arith.constant dense<0.000000e+00> : vector<20x64xf32>
    %131 = tpu.matmul %129, %130, %cst_44 {dimension_numbers = #tpu.dot_dimension_numbers<[1], [0], [0], [1], [0, 0, 1, 1], [], []>} : vector<20x96xf32>, vector<96x64xf32>, vector<20x64xf32> -> vector<20x64xf32>
    %c0_45 = arith.constant 0 : index
    %c0_46 = arith.constant 0 : index
    %132 = vector.load %arg11[%c0_45, %c0_46] : memref<1x8xf32, #tpu.memory_space<vmem>>, vector<1x8xf32>
    %c0_47 = arith.constant 0 : index
    %c0_48 = arith.constant 0 : index
    %133 = vector.load %arg12[%c0_47, %c0_48] : memref<1x8xf32, #tpu.memory_space<vmem>>, vector<1x8xf32>
    %cst_49 = arith.constant dense<0.000000e+00> : vector<64xf32>
    %134 = vector.multi_reduction <add>, %131, %cst_49 [0] : vector<20x64xf32> to vector<64xf32>
    %135 = vector.shape_cast %134 : vector<64xf32> to vector<1x64xf32>
    %136 = vector.extract_strided_slice %135 {offsets = [0, 0], sizes = [1, 8], strides = [1, 1]} : vector<1x64xf32> to vector<1x8xf32>
    %137 = vector.extract_strided_slice %135 {offsets = [0, 8], sizes = [1, 8], strides = [1, 1]} : vector<1x64xf32> to vector<1x8xf32>
    %138 = arith.addf %136, %137 : vector<1x8xf32>
    %139 = vector.extract_strided_slice %135 {offsets = [0, 16], sizes = [1, 8], strides = [1, 1]} : vector<1x64xf32> to vector<1x8xf32>
    %140 = arith.addf %138, %139 : vector<1x8xf32>
    %141 = vector.extract_strided_slice %135 {offsets = [0, 24], sizes = [1, 8], strides = [1, 1]} : vector<1x64xf32> to vector<1x8xf32>
    %142 = arith.addf %140, %141 : vector<1x8xf32>
    %143 = vector.extract_strided_slice %135 {offsets = [0, 32], sizes = [1, 8], strides = [1, 1]} : vector<1x64xf32> to vector<1x8xf32>
    %144 = arith.addf %142, %143 : vector<1x8xf32>
    %145 = vector.extract_strided_slice %135 {offsets = [0, 40], sizes = [1, 8], strides = [1, 1]} : vector<1x64xf32> to vector<1x8xf32>
    %146 = arith.addf %144, %145 : vector<1x8xf32>
    %147 = vector.extract_strided_slice %135 {offsets = [0, 48], sizes = [1, 8], strides = [1, 1]} : vector<1x64xf32> to vector<1x8xf32>
    %148 = arith.addf %146, %147 : vector<1x8xf32>
    %149 = vector.extract_strided_slice %135 {offsets = [0, 56], sizes = [1, 8], strides = [1, 1]} : vector<1x64xf32> to vector<1x8xf32>
    %150 = arith.addf %148, %149 : vector<1x8xf32>
    %cst_50 = arith.constant 6.250000e-03 : f32
    %151 = vector.broadcast %cst_50 : f32 to vector<1x8xf32>
    %152 = arith.mulf %150, %151 : vector<1x8xf32>
    %153 = tpu.concatenate %152, %152, %152, %152, %152, %152, %152, %152 in 1 : vector<1x8xf32>, vector<1x8xf32>, vector<1x8xf32>, vector<1x8xf32>, vector<1x8xf32>, vector<1x8xf32>, vector<1x8xf32>, vector<1x8xf32> -> vector<1x64xf32>
    %154 = vector.broadcast %153 : vector<1x64xf32> to vector<20x64xf32>
    %155 = arith.subf %131, %154 : vector<20x64xf32>
    %156 = arith.mulf %155, %155 : vector<20x64xf32>
    %cst_51 = arith.constant dense<0.000000e+00> : vector<64xf32>
    %157 = vector.multi_reduction <add>, %156, %cst_51 [0] : vector<20x64xf32> to vector<64xf32>
    %158 = vector.shape_cast %157 : vector<64xf32> to vector<1x64xf32>
    %159 = vector.extract_strided_slice %158 {offsets = [0, 0], sizes = [1, 8], strides = [1, 1]} : vector<1x64xf32> to vector<1x8xf32>
    %160 = vector.extract_strided_slice %158 {offsets = [0, 8], sizes = [1, 8], strides = [1, 1]} : vector<1x64xf32> to vector<1x8xf32>
    %161 = arith.addf %159, %160 : vector<1x8xf32>
    %162 = vector.extract_strided_slice %158 {offsets = [0, 16], sizes = [1, 8], strides = [1, 1]} : vector<1x64xf32> to vector<1x8xf32>
    %163 = arith.addf %161, %162 : vector<1x8xf32>
    %164 = vector.extract_strided_slice %158 {offsets = [0, 24], sizes = [1, 8], strides = [1, 1]} : vector<1x64xf32> to vector<1x8xf32>
    %165 = arith.addf %163, %164 : vector<1x8xf32>
    %166 = vector.extract_strided_slice %158 {offsets = [0, 32], sizes = [1, 8], strides = [1, 1]} : vector<1x64xf32> to vector<1x8xf32>
    %167 = arith.addf %165, %166 : vector<1x8xf32>
    %168 = vector.extract_strided_slice %158 {offsets = [0, 40], sizes = [1, 8], strides = [1, 1]} : vector<1x64xf32> to vector<1x8xf32>
    %169 = arith.addf %167, %168 : vector<1x8xf32>
    %170 = vector.extract_strided_slice %158 {offsets = [0, 48], sizes = [1, 8], strides = [1, 1]} : vector<1x64xf32> to vector<1x8xf32>
    %171 = arith.addf %169, %170 : vector<1x8xf32>
    %172 = vector.extract_strided_slice %158 {offsets = [0, 56], sizes = [1, 8], strides = [1, 1]} : vector<1x64xf32> to vector<1x8xf32>
    %173 = arith.addf %171, %172 : vector<1x8xf32>
    %cst_52 = arith.constant 6.250000e-03 : f32
    %174 = vector.broadcast %cst_52 : f32 to vector<1x8xf32>
    %175 = arith.mulf %173, %174 : vector<1x8xf32>
    %cst_53 = arith.constant 9.99999974E-6 : f32
    %176 = vector.broadcast %cst_53 : f32 to vector<1x8xf32>
    %177 = arith.addf %175, %176 : vector<1x8xf32>
    %178 = math.rsqrt %177 : vector<1x8xf32>
    %179 = arith.mulf %132, %178 : vector<1x8xf32>
    %180 = tpu.concatenate %179, %179, %179, %179, %179, %179, %179, %179 in 1 : vector<1x8xf32>, vector<1x8xf32>, vector<1x8xf32>, vector<1x8xf32>, vector<1x8xf32>, vector<1x8xf32>, vector<1x8xf32>, vector<1x8xf32> -> vector<1x64xf32>
    %181 = tpu.concatenate %133, %133, %133, %133, %133, %133, %133, %133 in 1 : vector<1x8xf32>, vector<1x8xf32>, vector<1x8xf32>, vector<1x8xf32>, vector<1x8xf32>, vector<1x8xf32>, vector<1x8xf32>, vector<1x8xf32> -> vector<1x64xf32>
    %182 = vector.broadcast %180 : vector<1x64xf32> to vector<20x64xf32>
    %183 = arith.mulf %155, %182 : vector<20x64xf32>
    %184 = vector.broadcast %181 : vector<1x64xf32> to vector<20x64xf32>
    %185 = arith.addf %183, %184 : vector<20x64xf32>
    %cst_54 = arith.constant 0.000000e+00 : f32
    %186 = vector.broadcast %cst_54 : f32 to vector<20x64xf32>
    %187 = arith.maximumf %185, %186 : vector<20x64xf32>
    %188 = vector.extract_strided_slice %187 {offsets = [0, 56], sizes = [20, 8], strides = [1, 1]} : vector<20x64xf32> to vector<20x8xf32>
    %189 = vector.extract_strided_slice %187 {offsets = [0, 0], sizes = [20, 8], strides = [1, 1]} : vector<20x64xf32> to vector<20x8xf32>
    %cst_55 = arith.constant 0.000000e+00 : f32
    %190 = vector.broadcast %cst_55 : f32 to vector<1x8xf32>
    %191 = vector.extract_strided_slice %188 {offsets = [0, 0], sizes = [9, 8], strides = [1, 1]} : vector<20x8xf32> to vector<9x8xf32>
    %192 = vector.extract_strided_slice %189 {offsets = [1, 0], sizes = [9, 8], strides = [1, 1]} : vector<20x8xf32> to vector<9x8xf32>
    %193 = vector.extract_strided_slice %188 {offsets = [10, 0], sizes = [9, 8], strides = [1, 1]} : vector<20x8xf32> to vector<9x8xf32>
    %194 = vector.extract_strided_slice %189 {offsets = [11, 0], sizes = [9, 8], strides = [1, 1]} : vector<20x8xf32> to vector<9x8xf32>
    %195 = tpu.concatenate %190, %191, %190, %193 in 0 : vector<1x8xf32>, vector<9x8xf32>, vector<1x8xf32>, vector<9x8xf32> -> vector<20x8xf32>
    %196 = tpu.concatenate %192, %190, %194, %190 in 0 : vector<9x8xf32>, vector<1x8xf32>, vector<9x8xf32>, vector<1x8xf32> -> vector<20x8xf32>
    %197 = tpu.concatenate %195, %187, %196 in 1 : vector<20x8xf32>, vector<20x64xf32>, vector<20x8xf32> -> vector<20x80xf32>
    %c0_56 = arith.constant 0 : index
    %c0_57 = arith.constant 0 : index
    %198 = vector.load %arg13[%c0_56, %c0_57] : memref<80x64xf32, #tpu.memory_space<vmem>>, vector<80x64xf32>
    %cst_58 = arith.constant dense<0.000000e+00> : vector<20x64xf32>
    %199 = tpu.matmul %197, %198, %cst_58 {dimension_numbers = #tpu.dot_dimension_numbers<[1], [0], [0], [1], [0, 0, 1, 1], [], []>} : vector<20x80xf32>, vector<80x64xf32>, vector<20x64xf32> -> vector<20x64xf32>
    %c0_59 = arith.constant 0 : index
    %c0_60 = arith.constant 0 : index
    %200 = vector.load %arg14[%c0_59, %c0_60] : memref<1x4xf32, #tpu.memory_space<vmem>>, vector<1x4xf32>
    %c0_61 = arith.constant 0 : index
    %c0_62 = arith.constant 0 : index
    %201 = vector.load %arg15[%c0_61, %c0_62] : memref<1x4xf32, #tpu.memory_space<vmem>>, vector<1x4xf32>
    %cst_63 = arith.constant dense<0.000000e+00> : vector<64xf32>
    %202 = vector.multi_reduction <add>, %199, %cst_63 [0] : vector<20x64xf32> to vector<64xf32>
    %203 = vector.shape_cast %202 : vector<64xf32> to vector<1x64xf32>
    %204 = vector.extract_strided_slice %203 {offsets = [0, 0], sizes = [1, 4], strides = [1, 1]} : vector<1x64xf32> to vector<1x4xf32>
    %205 = vector.extract_strided_slice %203 {offsets = [0, 4], sizes = [1, 4], strides = [1, 1]} : vector<1x64xf32> to vector<1x4xf32>
    %206 = arith.addf %204, %205 : vector<1x4xf32>
    %207 = vector.extract_strided_slice %203 {offsets = [0, 8], sizes = [1, 4], strides = [1, 1]} : vector<1x64xf32> to vector<1x4xf32>
    %208 = arith.addf %206, %207 : vector<1x4xf32>
    %209 = vector.extract_strided_slice %203 {offsets = [0, 12], sizes = [1, 4], strides = [1, 1]} : vector<1x64xf32> to vector<1x4xf32>
    %210 = arith.addf %208, %209 : vector<1x4xf32>
    %211 = vector.extract_strided_slice %203 {offsets = [0, 16], sizes = [1, 4], strides = [1, 1]} : vector<1x64xf32> to vector<1x4xf32>
    %212 = arith.addf %210, %211 : vector<1x4xf32>
    %213 = vector.extract_strided_slice %203 {offsets = [0, 20], sizes = [1, 4], strides = [1, 1]} : vector<1x64xf32> to vector<1x4xf32>
    %214 = arith.addf %212, %213 : vector<1x4xf32>
    %215 = vector.extract_strided_slice %203 {offsets = [0, 24], sizes = [1, 4], strides = [1, 1]} : vector<1x64xf32> to vector<1x4xf32>
    %216 = arith.addf %214, %215 : vector<1x4xf32>
    %217 = vector.extract_strided_slice %203 {offsets = [0, 28], sizes = [1, 4], strides = [1, 1]} : vector<1x64xf32> to vector<1x4xf32>
    %218 = arith.addf %216, %217 : vector<1x4xf32>
    %219 = vector.extract_strided_slice %203 {offsets = [0, 32], sizes = [1, 4], strides = [1, 1]} : vector<1x64xf32> to vector<1x4xf32>
    %220 = arith.addf %218, %219 : vector<1x4xf32>
    %221 = vector.extract_strided_slice %203 {offsets = [0, 36], sizes = [1, 4], strides = [1, 1]} : vector<1x64xf32> to vector<1x4xf32>
    %222 = arith.addf %220, %221 : vector<1x4xf32>
    %223 = vector.extract_strided_slice %203 {offsets = [0, 40], sizes = [1, 4], strides = [1, 1]} : vector<1x64xf32> to vector<1x4xf32>
    %224 = arith.addf %222, %223 : vector<1x4xf32>
    %225 = vector.extract_strided_slice %203 {offsets = [0, 44], sizes = [1, 4], strides = [1, 1]} : vector<1x64xf32> to vector<1x4xf32>
    %226 = arith.addf %224, %225 : vector<1x4xf32>
    %227 = vector.extract_strided_slice %203 {offsets = [0, 48], sizes = [1, 4], strides = [1, 1]} : vector<1x64xf32> to vector<1x4xf32>
    %228 = arith.addf %226, %227 : vector<1x4xf32>
    %229 = vector.extract_strided_slice %203 {offsets = [0, 52], sizes = [1, 4], strides = [1, 1]} : vector<1x64xf32> to vector<1x4xf32>
    %230 = arith.addf %228, %229 : vector<1x4xf32>
    %231 = vector.extract_strided_slice %203 {offsets = [0, 56], sizes = [1, 4], strides = [1, 1]} : vector<1x64xf32> to vector<1x4xf32>
    %232 = arith.addf %230, %231 : vector<1x4xf32>
    %233 = vector.extract_strided_slice %203 {offsets = [0, 60], sizes = [1, 4], strides = [1, 1]} : vector<1x64xf32> to vector<1x4xf32>
    %234 = arith.addf %232, %233 : vector<1x4xf32>
    %cst_64 = arith.constant 3.125000e-03 : f32
    %235 = vector.broadcast %cst_64 : f32 to vector<1x4xf32>
    %236 = arith.mulf %234, %235 : vector<1x4xf32>
    %237 = tpu.concatenate %236, %236, %236, %236, %236, %236, %236, %236, %236, %236, %236, %236, %236, %236, %236, %236 in 1 : vector<1x4xf32>, vector<1x4xf32>, vector<1x4xf32>, vector<1x4xf32>, vector<1x4xf32>, vector<1x4xf32>, vector<1x4xf32>, vector<1x4xf32>, vector<1x4xf32>, vector<1x4xf32>, vector<1x4xf32>, vector<1x4xf32>, vector<1x4xf32>, vector<1x4xf32>, vector<1x4xf32>, vector<1x4xf32> -> vector<1x64xf32>
    %238 = vector.broadcast %237 : vector<1x64xf32> to vector<20x64xf32>
    %239 = arith.subf %199, %238 : vector<20x64xf32>
    %240 = arith.mulf %239, %239 : vector<20x64xf32>
    %cst_65 = arith.constant dense<0.000000e+00> : vector<64xf32>
    %241 = vector.multi_reduction <add>, %240, %cst_65 [0] : vector<20x64xf32> to vector<64xf32>
    %242 = vector.shape_cast %241 : vector<64xf32> to vector<1x64xf32>
    %243 = vector.extract_strided_slice %242 {offsets = [0, 0], sizes = [1, 4], strides = [1, 1]} : vector<1x64xf32> to vector<1x4xf32>
    %244 = vector.extract_strided_slice %242 {offsets = [0, 4], sizes = [1, 4], strides = [1, 1]} : vector<1x64xf32> to vector<1x4xf32>
    %245 = arith.addf %243, %244 : vector<1x4xf32>
    %246 = vector.extract_strided_slice %242 {offsets = [0, 8], sizes = [1, 4], strides = [1, 1]} : vector<1x64xf32> to vector<1x4xf32>
    %247 = arith.addf %245, %246 : vector<1x4xf32>
    %248 = vector.extract_strided_slice %242 {offsets = [0, 12], sizes = [1, 4], strides = [1, 1]} : vector<1x64xf32> to vector<1x4xf32>
    %249 = arith.addf %247, %248 : vector<1x4xf32>
    %250 = vector.extract_strided_slice %242 {offsets = [0, 16], sizes = [1, 4], strides = [1, 1]} : vector<1x64xf32> to vector<1x4xf32>
    %251 = arith.addf %249, %250 : vector<1x4xf32>
    %252 = vector.extract_strided_slice %242 {offsets = [0, 20], sizes = [1, 4], strides = [1, 1]} : vector<1x64xf32> to vector<1x4xf32>
    %253 = arith.addf %251, %252 : vector<1x4xf32>
    %254 = vector.extract_strided_slice %242 {offsets = [0, 24], sizes = [1, 4], strides = [1, 1]} : vector<1x64xf32> to vector<1x4xf32>
    %255 = arith.addf %253, %254 : vector<1x4xf32>
    %256 = vector.extract_strided_slice %242 {offsets = [0, 28], sizes = [1, 4], strides = [1, 1]} : vector<1x64xf32> to vector<1x4xf32>
    %257 = arith.addf %255, %256 : vector<1x4xf32>
    %258 = vector.extract_strided_slice %242 {offsets = [0, 32], sizes = [1, 4], strides = [1, 1]} : vector<1x64xf32> to vector<1x4xf32>
    %259 = arith.addf %257, %258 : vector<1x4xf32>
    %260 = vector.extract_strided_slice %242 {offsets = [0, 36], sizes = [1, 4], strides = [1, 1]} : vector<1x64xf32> to vector<1x4xf32>
    %261 = arith.addf %259, %260 : vector<1x4xf32>
    %262 = vector.extract_strided_slice %242 {offsets = [0, 40], sizes = [1, 4], strides = [1, 1]} : vector<1x64xf32> to vector<1x4xf32>
    %263 = arith.addf %261, %262 : vector<1x4xf32>
    %264 = vector.extract_strided_slice %242 {offsets = [0, 44], sizes = [1, 4], strides = [1, 1]} : vector<1x64xf32> to vector<1x4xf32>
    %265 = arith.addf %263, %264 : vector<1x4xf32>
    %266 = vector.extract_strided_slice %242 {offsets = [0, 48], sizes = [1, 4], strides = [1, 1]} : vector<1x64xf32> to vector<1x4xf32>
    %267 = arith.addf %265, %266 : vector<1x4xf32>
    %268 = vector.extract_strided_slice %242 {offsets = [0, 52], sizes = [1, 4], strides = [1, 1]} : vector<1x64xf32> to vector<1x4xf32>
    %269 = arith.addf %267, %268 : vector<1x4xf32>
    %270 = vector.extract_strided_slice %242 {offsets = [0, 56], sizes = [1, 4], strides = [1, 1]} : vector<1x64xf32> to vector<1x4xf32>
    %271 = arith.addf %269, %270 : vector<1x4xf32>
    %272 = vector.extract_strided_slice %242 {offsets = [0, 60], sizes = [1, 4], strides = [1, 1]} : vector<1x64xf32> to vector<1x4xf32>
    %273 = arith.addf %271, %272 : vector<1x4xf32>
    %cst_66 = arith.constant 3.125000e-03 : f32
    %274 = vector.broadcast %cst_66 : f32 to vector<1x4xf32>
    %275 = arith.mulf %273, %274 : vector<1x4xf32>
    %cst_67 = arith.constant 9.99999974E-6 : f32
    %276 = vector.broadcast %cst_67 : f32 to vector<1x4xf32>
    %277 = arith.addf %275, %276 : vector<1x4xf32>
    %278 = math.rsqrt %277 : vector<1x4xf32>
    %279 = arith.mulf %200, %278 : vector<1x4xf32>
    %280 = tpu.concatenate %279, %279, %279, %279, %279, %279, %279, %279, %279, %279, %279, %279, %279, %279, %279, %279 in 1 : vector<1x4xf32>, vector<1x4xf32>, vector<1x4xf32>, vector<1x4xf32>, vector<1x4xf32>, vector<1x4xf32>, vector<1x4xf32>, vector<1x4xf32>, vector<1x4xf32>, vector<1x4xf32>, vector<1x4xf32>, vector<1x4xf32>, vector<1x4xf32>, vector<1x4xf32>, vector<1x4xf32>, vector<1x4xf32> -> vector<1x64xf32>
    %281 = tpu.concatenate %201, %201, %201, %201, %201, %201, %201, %201, %201, %201, %201, %201, %201, %201, %201, %201 in 1 : vector<1x4xf32>, vector<1x4xf32>, vector<1x4xf32>, vector<1x4xf32>, vector<1x4xf32>, vector<1x4xf32>, vector<1x4xf32>, vector<1x4xf32>, vector<1x4xf32>, vector<1x4xf32>, vector<1x4xf32>, vector<1x4xf32>, vector<1x4xf32>, vector<1x4xf32>, vector<1x4xf32>, vector<1x4xf32> -> vector<1x64xf32>
    %282 = vector.broadcast %280 : vector<1x64xf32> to vector<20x64xf32>
    %283 = arith.mulf %239, %282 : vector<20x64xf32>
    %284 = vector.broadcast %281 : vector<1x64xf32> to vector<20x64xf32>
    %285 = arith.addf %283, %284 : vector<20x64xf32>
    %cst_68 = arith.constant 0.000000e+00 : f32
    %286 = vector.broadcast %cst_68 : f32 to vector<20x64xf32>
    %287 = arith.maximumf %285, %286 : vector<20x64xf32>
    %288 = vector.extract_strided_slice %287 {offsets = [0, 60], sizes = [20, 4], strides = [1, 1]} : vector<20x64xf32> to vector<20x4xf32>
    %289 = vector.extract_strided_slice %287 {offsets = [0, 0], sizes = [20, 4], strides = [1, 1]} : vector<20x64xf32> to vector<20x4xf32>
    %cst_69 = arith.constant 0.000000e+00 : f32
    %290 = vector.broadcast %cst_69 : f32 to vector<1x4xf32>
    %291 = vector.extract_strided_slice %288 {offsets = [0, 0], sizes = [9, 4], strides = [1, 1]} : vector<20x4xf32> to vector<9x4xf32>
    %292 = vector.extract_strided_slice %289 {offsets = [1, 0], sizes = [9, 4], strides = [1, 1]} : vector<20x4xf32> to vector<9x4xf32>
    %293 = vector.extract_strided_slice %288 {offsets = [10, 0], sizes = [9, 4], strides = [1, 1]} : vector<20x4xf32> to vector<9x4xf32>
    %294 = vector.extract_strided_slice %289 {offsets = [11, 0], sizes = [9, 4], strides = [1, 1]} : vector<20x4xf32> to vector<9x4xf32>
    %295 = tpu.concatenate %290, %291, %290, %293 in 0 : vector<1x4xf32>, vector<9x4xf32>, vector<1x4xf32>, vector<9x4xf32> -> vector<20x4xf32>
    %296 = tpu.concatenate %292, %290, %294, %290 in 0 : vector<9x4xf32>, vector<1x4xf32>, vector<9x4xf32>, vector<1x4xf32> -> vector<20x4xf32>
    %297 = tpu.concatenate %295, %287, %296 in 1 : vector<20x4xf32>, vector<20x64xf32>, vector<20x4xf32> -> vector<20x72xf32>
    %c0_70 = arith.constant 0 : index
    %c0_71 = arith.constant 0 : index
    %298 = vector.load %arg16[%c0_70, %c0_71] : memref<72x192xf32, #tpu.memory_space<vmem>>, vector<72x192xf32>
    %cst_72 = arith.constant dense<0.000000e+00> : vector<20x192xf32>
    %299 = tpu.matmul %297, %298, %cst_72 {dimension_numbers = #tpu.dot_dimension_numbers<[1], [0], [0], [1], [0, 0, 1, 1], [], []>} : vector<20x72xf32>, vector<72x192xf32>, vector<20x192xf32> -> vector<20x192xf32>
    %300 = math.tanh %299 : vector<20x192xf32>
    %c0_73 = arith.constant 0 : index
    %c0_74 = arith.constant 0 : index
    %301 = vector.load %arg17[%c0_73, %c0_74] : memref<20x192xf32, #tpu.memory_space<vmem>>, vector<20x192xf32>
    tpu.vector_store %arg17[%c0_73, %c0_74], %300 {strides = array<i32>} : memref<20x192xf32, #tpu.memory_space<vmem>>, vector<20x192xf32>,
    return
  }
}

</mosaic_0001>

<bundles_post_ra>
// kernel: decoder_forward.1
= control target key start
LH: loop header
LB: loop body
LE: loop exit
PB: predicated region body
PF: predicated region fallthrough
CT: control target
= control target key end

     0   :  { %v2148_v0 = vmov 0.0   ;;  %vm2149_vm0 = vmmov 0   ;;  %vm69_vm1 = vcmask 654336   ;;  %vm3224_vm2 = vcmask 523264   ;;  %s3211_s30 = smov 16   ;;  %s2156_s18 = smov 48   ;;  %s3191_s1 = inlined_call_operand.vmem [shape: f32[80,64], index: 1, kind: input, shape index: {}]   ;;  %s3192_s0 = inlined_call_operand.vmem [shape: f32[20,80], index: 0, kind: input, shape index: {}]   ;;  %s3193_s4 = inlined_call_operand.vmem [shape: f32[192,64], index: 4, kind: input, shape index: {}]   ;;  %s3194_s2 = inlined_call_operand.vmem [shape: f32[1,64], index: 2, kind: input, shape index: {}]   ;;  %s3195_s3 = inlined_call_operand.vmem [shape: f32[1,64], index: 3, kind: input, shape index: {}]   ;;  %s3196_s6 = inlined_call_operand.vmem [shape: f32[1,32], index: 6, kind: input, shape index: {}]   ;;  %s3197_s5 = inlined_call_operand.vmem [shape: f32[1,32], index: 5, kind: input, shape index: {}]   ;;  %s3198_s7 = inlined_call_operand.vmem [shape: f32[128,64], index: 7, kind: input, shape index: {}]   ;;  %s3199_s9 = inlined_call_operand.vmem [shape: f32[1,16], index: 9, kind: input, shape index: {}]   ;;  %s3200_s8 = inlined_call_operand.vmem [shape: f32[1,16], index: 8, kind: input, shape index: {}]   ;;  %s3201_s10 = inlined_call_operand.vmem [shape: f32[96,64], index: 10, kind: input, shape index: {}]   ;;  %s3202_s12 = inlined_call_operand.vmem [shape: f32[1,8], index: 12, kind: input, shape index: {}]   ;;  %s3203_s11 = inlined_call_operand.vmem [shape: f32[1,8], index: 11, kind: input, shape index: {}]   ;;  %s3204_s13 = inlined_call_operand.vmem [shape: f32[80,64], index: 13, kind: input, shape index: {}]   ;;  %s3205_s15 = inlined_call_operand.vmem [shape: f32[1,4], index: 15, kind: input, shape index: {}]   ;;  %s3206_s14 = inlined_call_operand.vmem [shape: f32[1,4], index: 14, kind: input, shape index: {}]   ;;  %s3207_s16 = inlined_call_operand.vmem [shape: f32[72,192], index: 16, kind: input, shape index: {}]   ;;  %s3208_s17 = inlined_call_operand.vmem [shape: f32[20,192], index: 17, kind: output, shape index: {}]  }
   0x1   :  { %3225 = sst [smem:[#allocation2_spill]] %s3191_s1  ;;  %1923 = vmatprep.subr.mxu0 %v2148_v0  ;;  %1943 = vmatprep.mubr.msk.f32.mxu0 %vm2149_vm0, %v2148_v0  ;;  %v274_v14 = vld [vmem:[%s3193_s4 + $0x78] sm:$0xff]  ;;  %v273_v15 = vld [vmem:[%s3193_s4 + $0x70] sm:$0xff]  ;;  %v272_v16 = vld [vmem:[%s3193_s4 + $0x68] sm:$0xff]  ;;  %vm3223_vm3 = vcmask 519168   ;;  %vm3220_vm4 = vcmask 1046528  }
   0x2   :  { %3226 = sst [smem:[#allocation3_spill]] %s3192_s0  ;;  %291 = vmatprep.subr.mxu1 %v2148_v0  ;;  %v271_v17 = vld [vmem:[%s3193_s4 + $0x60] sm:$0xff]  ;;  %v270_v18 = vld [vmem:[%s3193_s4 + $0x58] sm:$0xff]  ;;  %v269_v19 = vld [vmem:[%s3193_s4 + $0x50] sm:$0xff]  ;;  %vm3221_vm5 = vcmask 1040384   ;;  %vm3219_vm6 = vcmask 1041408  }
   0x3   :  { %s3227_s26 = sld [smem:[#allocation2_spill]]  ;;  %292 = vmatpush1.msra.mxu1 %v274_v14  ;;  %v268_v20 = vld [vmem:[%s3193_s4 + $0x48] sm:$0xff]  ;;  %v267_v21 = vld [vmem:[%s3193_s4 + $0x40] sm:$0xff]  ;;  %v266_v22 = vld [vmem:[%s3193_s4 + $0x38] sm:$0xff]  ;;  %vm3218_vm7 = vcmask 1042432   ;;  %vm394_vm8 = vcmask 261120  }
   0x4   :  { %s3228_s19 = sld [smem:[#allocation3_spill]]  ;;  %293 = vmatprep.subr.mxu1 %v2148_v0  ;;  %v265_v23 = vld [vmem:[%s3193_s4 + $0x30] sm:$0xff]  ;;  %v264_v24 = vld [vmem:[%s3193_s4 + $0x28] sm:$0xff]  ;;  %v263_v25 = vld [vmem:[%s3193_s4 + $0x20] sm:$0xff]  ;;  %vm518_vm9 = vcmask 785408   ;;  %s2154_s1 = smov 80  }
   0x5   :  { %294 = vmatpush1.msra.mxu1 %v273_v15  ;;  %v262_v26 = vld [vmem:[%s3193_s4 + $0x18] sm:$0xff]  ;;  %v261_v27 = vld [vmem:[%s3193_s4 + $0x10] sm:$0xff]  ;;  %v260_v28 = vld [vmem:[%s3193_s4 + $0x8] sm:$0xff]  ;;  %vm655_vm10 = vcmask 130048   ;;  %vm658_vm11 = vcmask 392192   ;;  %s2158_s24 = smov 104  }
   0x6   :  { %295 = vmatprep.subr.mxu1 %v2148_v0  ;;  %v259_v29 = vld [vmem:[%s3193_s4] sm:$0xff]  ;;  %v282_v30 = vld [vmem:[%s3193_s4 + $0xb8] sm:$0xff]  ;;  %v281_v31 = vld [vmem:[%s3193_s4 + $0xb0] sm:$0xff]  ;;  %s2159_s25 = smov 88   ;;  %s2160_s27 = smov 72   ;;  %vm975_vm12 = vcmask 64512  }
   0x7   :  { %296 = vmatpush1.msra.mxu1 %v272_v16  ;;  %v280_v32 = vld [vmem:[%s3193_s4 + $0xa8] sm:$0xff]  ;;  %v279_v33 = vld [vmem:[%s3193_s4 + $0xa0] sm:$0xff]  ;;  %v278_v34 = vld [vmem:[%s3193_s4 + $0x98] sm:$0xff]  ;;  %s2161_s28 = smov 8   ;;  %s3213_s29 = smov 24   ;;  %vm978_vm13 = vcmask 195584  }
   0x8   :  { %297 = vmatprep.subr.mxu1 %v2148_v0  ;;  %v277_v35 = vld [vmem:[%s3193_s4 + $0x90] sm:$0xff]  ;;  %v276_v36 = vld [vmem:[%s3193_s4 + $0x88] sm:$0xff]  ;;  %v159_v14 = vld [vmem:[%s3194_s2] sm:$0x1]  ;;  %s2150_s2 = smov 64   ;;  %vm981_vm14 = vcmask 326656  }
   0x9   :  { %v68_v1 = vld [vmem:[%s3227_s26 + $0x48] sm:$0xff]  ;;  %v67_v2 = vld [vmem:[%s3227_s26 + $0x40] sm:$0xff]  ;;  %v66_v3 = vld [vmem:[%s3227_s26 + $0x38] sm:$0xff]  ;;  %298 = vmatpush1.msra.mxu1 %v271_v17  ;;  %vm984_vm15 = vcmask 457728   ;;  %s2167_s0 = smov 108   ;;  %s2169_s20 = smov 92  }
   0xa   :  { %1924 = vmatpush3.msra.mxu0 %v68_v1  ;;  %v65_v4 = vld [vmem:[%s3227_s26 + $0x30] sm:$0xff]  ;;  %v64_v5 = vld [vmem:[%s3227_s26 + $0x28] sm:$0xff]  ;;  %v63_v6 = vld [vmem:[%s3227_s26 + $0x20] sm:$0xff]  ;;  %299 = vmatprep.subr.mxu1 %v2148_v0  ;;  %s2173_s21 = smov 4   ;;  %s3215_s22 = smov 20  }
   0xb   :  { %1925 = vmatprep.subr.mxu0 %v2148_v0  ;;  %v62_v7 = vld [vmem:[%s3227_s26 + $0x18] sm:$0xff]  ;;  %v61_v8 = vld [vmem:[%s3227_s26 + $0x10] sm:$0xff]  ;;  %v60_v9 = vld [vmem:[%s3227_s26 + $0x8] sm:$0xff]  ;;  %300 = vmatpush1.msra.mxu1 %v270_v18  ;;  %s2177_s23 = smov 36  }
   0xc   :  { %1926 = vmatpush3.msra.mxu0 %v67_v2  ;;  %v59_v10 = vld [vmem:[%s3227_s26] sm:$0xff]  ;;  %v57_v12 = vld [vmem:[%s3228_s19 + $0x8] sm:$0xff]  ;;  %v58_v13 = vld [vmem:[%s3228_s19 + $0x10] sm:$0xf]  ;;  %301 = vmatprep.subr.mxu1 %v2148_v0  ;;  %s2172_s26 = smov 68  }
   0xd   :  { %1927 = vmatprep.subr.mxu0 %v2148_v0  ;;  %v56_v11 = vld [vmem:[%s3228_s19] sm:$0xff]  ;;  %302 = vmatpush1.msra.mxu1 %v269_v19  ;;  %s2164_s19 = smov 56  }
   0xe   :  { %1928 = vmatpush3.msra.mxu0 %v66_v3  ;;  %303 = vmatprep.subr.mxu1 %v2148_v0  ;;  %v1850_v19 = vld [vmem:[%s3195_s3] ss:$0 sm:$0xff]  ;;  %s2151_s3 = smov 96  }
   0xf   :  { %1929 = vmatprep.subr.mxu0 %v2148_v0  ;;  %304 = vmatpush1.msra.mxu1 %v268_v20 }
  0x10   :  { %1930 = vmatpush3.msra.mxu0 %v65_v4  ;;  %305 = vmatprep.subr.mxu1 %v2148_v0 }
  0x11   :  { %1931 = vmatprep.subr.mxu0 %v2148_v0  ;;  %306 = vmatpush1.msra.mxu1 %v267_v21 }
  0x12   :  { %1932 = vmatpush3.msra.mxu0 %v64_v5  ;;  %307 = vmatprep.subr.mxu1 %v2148_v0 }
  0x13   :  { %1933 = vmatprep.subr.mxu0 %v2148_v0  ;;  %308 = vmatpush1.msra.mxu1 %v266_v22 }
  0x14   :  { %1934 = vmatpush3.msra.mxu0 %v63_v6  ;;  %309 = vmatprep.subr.mxu1 %v2148_v0 }
  0x15   :  { %1935 = vmatprep.subr.mxu0 %v2148_v0  ;;  %310 = vmatpush1.msra.mxu1 %v265_v23 }
  0x16   :  { %1936 = vmatpush3.msra.mxu0 %v62_v7  ;;  %311 = vmatprep.subr.mxu1 %v2148_v0 }
  0x17   :  { %1937 = vmatprep.subr.mxu0 %v2148_v0  ;;  %312 = vmatpush1.msra.mxu1 %v264_v24 }
  0x18   :  { %1938 = vmatpush3.msra.mxu0 %v61_v8  ;;  %313 = vmatprep.subr.mxu1 %v2148_v0 }
  0x19   :  { %1939 = vmatprep.subr.mxu0 %v2148_v0  ;;  %314 = vmatpush1.msra.mxu1 %v263_v25 }
  0x1a   :  { %1940 = vmatpush3.msra.mxu0 %v60_v9  ;;  %315 = vmatprep.subr.mxu1 %v2148_v0 }
  0x1b   :  { %1941 = vmatprep.subr.mxu0 %v2148_v0  ;;  %316 = vmatpush1.msra.mxu1 %v262_v26 }
  0x1c   :  { %1942 = vmatpush3.msra.mxu0 %v59_v10  ;;  %317 = vmatprep.subr.mxu1 %v2148_v0 }
  0x1d   :  { %1944 = vmatmul.mubr.msk.f32.vlgmr.msra.gmra.mxu0 %vm69_vm1, %v56_v11  ;;  %1952 = vmatprep.subr.mxu0 %v2148_v0  ;;  %v197_v11 = vlaneseq }
  0x1e   :  { %1946 = vmatprep.mubr.msk.f32.mxu0 %vm2149_vm0, %v2148_v0  ;;  %318 = vmatpush1.msra.mxu1 %v261_v27 }
  0x1f   :  { %319 = vmatprep.subr.mxu1 %v2148_v0 }
  0x20   :  { %320 = vmatpush1.msra.mxu1 %v260_v28 }
  0x21   :  { %1947 = vmatmul.mubr.msk.f32.gmra.mxu0 %vm69_vm1, %v57_v12  ;;  %321 = vmatprep.subr.mxu1 %v2148_v0  ;;  %v198_v12 = vshrl.u32 %v197_v11, 7 }
  0x22   :  { %1949 = vmatprep.mubr.msk.f32.mxu0 %vm2149_vm0, %v2148_v0  ;;  %322 = vmatpush1.msra.mxu1 %v259_v29 }
  0x23   :  { %339 = vmatprep.subr.mxu1 %v2148_v0  ;;  %v2437_v15 = vsub.s32 0, %v198_v12 }
  0x24   :  { %340 = vmatpush2.msra.mxu1 %v282_v30 }
  0x25   :  { %1950 = vmatmul.mubr.msk.f32.gmra.mxu0 %vm69_vm1, %v58_v13  ;;  %341 = vmatprep.subr.mxu1 %v2148_v0  ;;  %v275_v13 = vld [vmem:[%s3193_s4 + $0x80] sm:$0xff]  ;;  %s2152_s4 = smov 32  }
  0x26   :  { %1984 = vmatprep.mubr.msk.f32.mxu0 %vm2149_vm0, %v2148_v0  ;;  %342 = vmatpush2.msra.mxu1 %v281_v31 }
  0x27   :  { %343 = vmatprep.subr.mxu1 %v2148_v0 }
  0x28   :  { %344 = vmatpush2.msra.mxu1 %v280_v32 }
  0x29   :  { %345 = vmatprep.subr.mxu1 %v2148_v0 }
  0x2a   :  { %346 = vmatpush2.msra.mxu1 %v279_v33 }
  0x2b   :  { %347 = vmatprep.subr.mxu1 %v2148_v0 }
  0x2c   :  { %348 = vmatpush2.msra.mxu1 %v278_v34 }
  0x2d   :  { %349 = vmatprep.subr.mxu1 %v2148_v0 }
  0x2e   :  { %350 = vmatpush2.msra.mxu1 %v277_v35 }
  0x2f   :  { %351 = vmatprep.subr.mxu1 %v2148_v0 }
  0x30   :  { %352 = vmatpush2.msra.mxu1 %v276_v36 }
  0x31   :  { %353 = vmatprep.subr.mxu1 %v2148_v0 }
  0x32   :  { %354 = vmatpush2.msra.mxu1 %v275_v13 }
  0x33   :  { %1993 = vmatprep.subr.mxu1 %v2148_v0 }
  0xdd   :  { %v145_v37 = vpop.f32.mrf.mxu0 }
  0xde   :  { %v162_v42 = vsel %vm3224_vm2, %v145_v37, 0.0 }
  0xdf   :  { %v1945_v38 = vpop.f32.mrf.mxu0 }
  0xe1   :  { %v150_v39 = vpop.f32.mrf.mxu0 }
  0xe2   :  { %v163_v40 = vsel %vm3224_vm2, %v150_v39, 0.0 }
  0xe3   :  { %v1948_v41 = vpop.f32.mrf.mxu0  ;;  %v164_v43 = vadd.f32 %v163_v40, %v162_v42 }
  0xe5   :  { %v155_v44 = vpop.f32.mrf.mxu0 }
  0xe6   :  { %v166_v45 = vsel %vm3223_vm3, %v155_v44, 0.0 }
  0xe7   :  { %v167_v46 = vadd.f32 %v166_v45, %v164_v43  ;;  %v1951_v47 = vpop.f32.mrf.mxu0 }
  0xe9   :  { %v168_v48 = vrot.slane %v167_v46, 4 }
  0xeb   :  { %v169_v49 = vadd.f32 %v168_v48, %v167_v46 }
  0xed   :  { %v170_v50 = vrot.slane %v169_v49, 2 }
  0xef   :  { %v171_v51 = vadd.f32 %v170_v50, %v169_v49 }
  0xf1   :  { %v172_v52 = vrot.slane %v171_v51, 1 }
  0xf3   :  { %v173_v53 = vadd.f32 %v172_v52, %v171_v51 }
  0xf5   :  { %v174_v54 = vmul.f32 0.05, %v173_v53 }
  0xf7   :  { %v175_v55 = vsub.f32 %v145_v37, %v174_v54  ;;  %v176_v56 = vsub.f32 %v150_v39, %v174_v54  ;;  %v177_v57 = vsub.f32 %v155_v44, %v174_v54 }
  0xf9   :  { %v178_v58 = vmul.f32 %v175_v55, %v175_v55  ;;  %v179_v59 = vmul.f32 %v176_v56, %v176_v56  ;;  %v180_v60 = vmul.f32 %v177_v57, %v177_v57 }
  0xfb   :  { %v181_v61 = vsel %vm3224_vm2, %v178_v58, 0.0  ;;  %v182_v62 = vsel %vm3224_vm2, %v179_v59, 0.0  ;;  %v184_v1 = vsel %vm3223_vm3, %v180_v60, 0.0 }
  0xfc   :  { %v183_v63 = vadd.f32 %v182_v62, %v181_v61 }
  0xfe   :  { %v185_v2 = vadd.f32 %v184_v1, %v183_v63 }
 0x100   :  { %v186_v3 = vrot.slane %v185_v2, 4 }
 0x102   :  { %v187_v4 = vadd.f32 %v186_v3, %v185_v2 }
 0x104   :  { %v188_v5 = vrot.slane %v187_v4, 2 }
 0x106   :  { %v189_v6 = vadd.f32 %v188_v5, %v187_v4 }
 0x108   :  { %v190_v7 = vrot.slane %v189_v6, 1 }
 0x10a   :  { %v191_v8 = vadd.f32 %v190_v7, %v189_v6 }
 0x10c   :  { %v192_v9 = vmul.f32 0.05, %v191_v8 }
 0x10e   :  { %v193_v10 = vadd.f32 1e-05, %v192_v9 }
 0x110   :  { %2126 = vrsqrt.f32 %v193_v10 }
 0x11d   :  { %v2127_v16 = vpop.eup %2126 }
 0x11e   :  { %v195_v17 = vmul.f32 %v2127_v16, %v159_v14 }
 0x120   :  { %v200_v18 = vrot.slane %v195_v17, %v2437_v15 }
 0x122   :  { %v204_v20 = vmul.f32 %v200_v18, %v177_v57  ;;  %v203_v21 = vmul.f32 %v200_v18, %v176_v56  ;;  %v202_v22 = vmul.f32 %v200_v18, %v175_v55 }
 0x124   :  { %v213_v23 = vadd.f32 %v1850_v19, %v204_v20  ;;  %v212_v24 = vadd.f32 %v1850_v19, %v203_v21  ;;  %v211_v25 = vadd.f32 %v1850_v19, %v202_v22 }
 0x126   :  { %v216_v26 = vmax.f32 %v213_v23, 0.0  ;;  %v214_v27 = vmax.f32 %v211_v25, 0.0  ;;  %v215_v28 = vmax.f32 %v212_v24, 0.0 }
 0x128   :  { %251 = vrot.lane.b32.xlu1 %v216_v26, %s2150_s2  ;;  %v240_v29 = vrot.slane %v216_v26, 1  ;;  %247 = vrot.lane.b32.xlu0 %v214_v27, %s2150_s2  ;;  %v236_v30 = vrot.slane %v214_v27, 1  ;;  %v237_v31 = vrot.slane %v215_v28, 1  ;;  %v220_v32 = vrot.slane %v214_v27, 7 }
 0x129   :  { %v221_v33 = vrot.slane %v215_v28, 7  ;;  %v226_v34 = vrot.slane %v216_v26, 7 }
 0x12a   :  { %v238_v35 = vsel %vm3220_vm4, %v236_v30, %v237_v31  ;;  %v241_v36 = vsel %vm3220_vm4, %v237_v31, %v240_v29  ;;  %v244_v37 = vsel %vm3221_vm5, %v237_v31, 0.0  ;;  %v230_v44 = vsel %vm3221_vm5, 0.0, %v220_v32 }
 0x12b   :  { %1851 = vmatprep.mubr.msk.f32.mxu1 %vm3224_vm2, %v238_v35  ;;  %v245_v38 = vsel %vm3219_vm6, %v244_v37, %v241_v36  ;;  %v222_v39 = vsel %vm3221_vm5, %v220_v32, %v221_v33  ;;  %v227_v40 = vsel %vm3221_vm5, %v221_v33, %v226_v34  ;;  %v246_v49 = vsel %vm3218_vm7, %v240_v29, 0.0  ;;  %v372_v29 = vld [vmem:[%s3196_s6] sm:$0x1]  ;;  %s2166_s6 = smov 116  }
 0x12c   :  { %249 = vrot.lane.b32.xlu0 %v215_v28, %s2150_s2  ;;  %v232_v41 = vsel %vm3219_vm6, %v222_v39, 0.0  ;;  %v439_v30 = vrot.slane %v372_v29, %v2437_v15  ;;  %v371_v35 = vld [vmem:[%s3197_s5] sm:$0x1]  ;;  %v537_v39 = vld [vmem:[%s3198_s7 + $0x78] sm:$0xff]  ;;  %s2163_s2 = smov 40   ;;  %s2176_s5 = smov 28  }
 0x12d   :  { %v234_v42 = vsel %vm3218_vm7, %v232_v41, %v221_v33  ;;  %1953 = vmatpush3.msra.mxu0 %v537_v39  ;;  %v535_v41 = vld [vmem:[%s3198_s7 + $0x68] sm:$0xff] }
 0x12e   :  { %1954 = vmatprep.subr.mxu0 %v2148_v0 }
 0x19a   :  { %v248_v43 = vpop.permute.xlu0 %247  ;;  %v252_v48 = vpop.permute.xlu1 %251 }
 0x19b   :  { %v256_v45 = vsel %vm3224_vm2, %v230_v44, %v248_v43  ;;  %v258_v50 = vsel %vm3224_vm2, %v227_v40, %v252_v48  ;;  %v536_v40 = vld [vmem:[%s3198_s7 + $0x70] sm:$0xff]  ;;  %v533_v43 = vld [vmem:[%s3198_s7 + $0x58] sm:$0xff] }
 0x19c   :  { %356 = vmatmul.mubr.f32.vlgmr.msra.gmra.mxu1 %v256_v45  ;;  %1955 = vmatpush3.msra.mxu0 %v536_v40  ;;  %v532_v44 = vld [vmem:[%s3198_s7 + $0x50] sm:$0xff]  ;;  %v531_v45 = vld [vmem:[%s3198_s7 + $0x48] sm:$0xff] }
 0x19d   :  { %1852 = vmatprep.mubr.msk.f32.mxu1 %vm3224_vm2, %v245_v38  ;;  %1956 = vmatprep.subr.mxu0 %v2148_v0  ;;  %v528_v48 = vld [vmem:[%s3198_s7 + $0x30] sm:$0xff] }
 0x19e   :  { %v250_v46 = vpop.permute.xlu0 %249  ;;  %1957 = vmatpush3.msra.mxu0 %v535_v41 }
 0x19f   :  { %v257_v47 = vsel %vm3224_vm2, %v234_v42, %v250_v46  ;;  %v534_v42 = vld [vmem:[%s3198_s7 + $0x60] sm:$0xff]  ;;  %1958 = vmatprep.subr.mxu0 %v2148_v0 }
 0x1a0   :  { %361 = vmatmul.mubr.f32.gmra.mxu1 %v257_v47  ;;  %1959 = vmatpush3.msra.mxu0 %v534_v42  ;;  %v530_v46 = vld [vmem:[%s3198_s7 + $0x40] sm:$0xff]  ;;  %v529_v47 = vld [vmem:[%s3198_s7 + $0x38] sm:$0xff] }
 0x1a1   :  { %1853 = vmatprep.mubr.msk.f32.mxu1 %vm3224_vm2, %v246_v49  ;;  %1960 = vmatprep.subr.mxu0 %v2148_v0  ;;  %v527_v49 = vld [vmem:[%s3198_s7 + $0x28] sm:$0xff] }
 0x1a2   :  { %1961 = vmatpush3.msra.mxu0 %v533_v43 }
 0x1a3   :  { %1962 = vmatprep.subr.mxu0 %v2148_v0 }
 0x1a4   :  { %366 = vmatmul.mubr.f32.gmra.mxu1 %v258_v50  ;;  %1963 = vmatpush3.msra.mxu0 %v532_v44  ;;  %v526_v50 = vld [vmem:[%s3198_s7 + $0x20] sm:$0xff] }
 0x1a5   :  { %2017 = vmatprep.mubr.msk.f32.mxu1 %vm2149_vm0, %v2148_v0  ;;  %1964 = vmatprep.subr.mxu0 %v2148_v0 }
 0x1a6   :  { %1965 = vmatpush3.msra.mxu0 %v531_v45 }
 0x1a7   :  { %1966 = vmatprep.subr.mxu0 %v2148_v0 }
 0x1a8   :  { %1967 = vmatpush3.msra.mxu0 %v530_v46 }
 0x1a9   :  { %1968 = vmatprep.subr.mxu0 %v2148_v0 }
 0x1aa   :  { %1969 = vmatpush3.msra.mxu0 %v529_v47 }
 0x1ab   :  { %1970 = vmatprep.subr.mxu0 %v2148_v0 }
 0x1ac   :  { %1971 = vmatpush3.msra.mxu0 %v528_v48 }
 0x1ad   :  { %1972 = vmatprep.subr.mxu0 %v2148_v0 }
 0x1ae   :  { %1973 = vmatpush3.msra.mxu0 %v527_v49 }
 0x1af   :  { %1974 = vmatprep.subr.mxu0 %v2148_v0 }
 0x1b0   :  { %1975 = vmatpush3.msra.mxu0 %v526_v50 }
 0x1b1   :  { %1976 = vmatprep.subr.mxu0 %v2148_v0 }
 0x25c   :  { %v357_v51 = vpop.f32.mrf.mxu1 }
 0x25d   :  { %v373_v56 = vsel %vm3224_vm2, %v357_v51, 0.0 }
 0x25e   :  { %v359_v52 = vpop.f32.mrf.mxu1 }
 0x260   :  { %v362_v53 = vpop.f32.mrf.mxu1 }
 0x261   :  { %v374_v54 = vsel %vm3224_vm2, %v362_v53, 0.0 }
 0x262   :  { %v364_v55 = vpop.f32.mrf.mxu1  ;;  %v375_v57 = vadd.f32 %v374_v54, %v373_v56 }
 0x264   :  { %v367_v58 = vpop.f32.mrf.mxu1 }
 0x265   :  { %v376_v59 = vsel %vm3223_vm3, %v367_v58, 0.0 }
 0x266   :  { %v377_v60 = vadd.f32 %v376_v59, %v375_v57  ;;  %v369_v61 = vpop.f32.mrf.mxu1 }
 0x268   :  { %v378_v62 = vrot.slane %v377_v60, 4 }
 0x26a   :  { %v379_v63 = vadd.f32 %v378_v62, %v377_v60  ;;  %v523_v62 = vld [vmem:[%s3198_s7 + $0x8] sm:$0xff] }
 0x26c   :  { %v380_v1 = vrot.slane %v379_v63, 2 }
 0x26e   :  { %v381_v2 = vadd.f32 %v380_v1, %v379_v63 }
 0x270   :  { %v382_v3 = vrot.slane %v381_v2, 1 }
 0x272   :  { %v383_v4 = vadd.f32 %v382_v3, %v381_v2  ;;  %v522_v3 = vld [vmem:[%s3198_s7] sm:$0xff] }
 0x274   :  { %385 = vrot.lane.b32.xlu1 %v383_v4, %s2151_s3 }
 0x2e6   :  { %v386_v5 = vpop.permute.xlu1 %385 }
 0x2e7   :  { %v388_v6 = vadd.f32 %v386_v5, %v383_v4 }
 0x2e9   :  { %v389_v7 = vmul.f32 0.025, %v388_v6 }
 0x2eb   :  { %391 = vrot.lane.b32.xlu0 %v389_v7, %s2152_s4 }
 0x35d   :  { %v392_v8 = vpop.permute.xlu0 %391 }
 0x35e   :  { %v395_v9 = vsel %vm394_vm8, %v389_v7, %v392_v8 }
 0x35f   :  { %v399_v10 = vrot.slane %v395_v9, %v2437_v15 }
 0x361   :  { %v2469_v11 = vsub.f32 %v357_v51, %v399_v10  ;;  %v2471_v12 = vsub.f32 %v362_v53, %v399_v10  ;;  %v2473_v13 = vsub.f32 %v367_v58, %v399_v10  ;;  %v525_v53 = vld [vmem:[%s3198_s7 + $0x18] sm:$0xff]  ;;  %v524_v58 = vld [vmem:[%s3198_s7 + $0x10] sm:$0xff]  ;;  %s2153_s7 = smov 112  }
 0x362   :  { %1977 = vmatpush3.msra.mxu0 %v525_v53 }
 0x363   :  { %v403_v14 = vmul.f32 %v2469_v11, %v2469_v11  ;;  %v404_v16 = vmul.f32 %v2471_v12, %v2471_v12  ;;  %v405_v17 = vmul.f32 %v2473_v13, %v2473_v13  ;;  %1978 = vmatprep.subr.mxu0 %v2148_v0 }
 0x364   :  { %1979 = vmatpush3.msra.mxu0 %v524_v58 }
 0x365   :  { %v406_v18 = vsel %vm3224_vm2, %v403_v14, 0.0  ;;  %v407_v19 = vsel %vm3224_vm2, %v404_v16, 0.0  ;;  %v409_v21 = vsel %vm3223_vm3, %v405_v17, 0.0  ;;  %1980 = vmatprep.subr.mxu0 %v2148_v0 }
 0x366   :  { %v408_v20 = vadd.f32 %v407_v19, %v406_v18  ;;  %1981 = vmatpush3.msra.mxu0 %v523_v62 }
 0x367   :  { %1982 = vmatprep.subr.mxu0 %v2148_v0 }
 0x368   :  { %v410_v22 = vadd.f32 %v409_v21, %v408_v20  ;;  %1983 = vmatpush3.msra.mxu0 %v522_v3 }
 0x369   :  { %2026 = vmatprep.subr.mxu0 %v2148_v0 }
 0x36a   :  { %v411_v23 = vrot.slane %v410_v22, 4 }
 0x36c   :  { %v412_v24 = vadd.f32 %v411_v23, %v410_v22 }
 0x36e   :  { %v413_v25 = vrot.slane %v412_v24, 2 }
 0x370   :  { %v414_v26 = vadd.f32 %v413_v25, %v412_v24 }
 0x372   :  { %v415_v27 = vrot.slane %v414_v26, 1 }
 0x374   :  { %v416_v28 = vadd.f32 %v415_v27, %v414_v26 }
 0x376   :  { %418 = vrot.lane.b32.xlu1 %v416_v28, %s2151_s3 }
 0x37a   :  { %440 = vrot.lane.b32.xlu1 %v439_v30, %s2152_s4 }
 0x3e8   :  { %v419_v31 = vpop.permute.xlu1 %418 }
 0x3e9   :  { %v421_v32 = vadd.f32 %v419_v31, %v416_v28 }
 0x3eb   :  { %v422_v33 = vmul.f32 0.025, %v421_v32 }
 0x3ec   :  { %v441_v51 = vpop.permute.xlu1 %440 }
 0x3ed   :  { %v423_v34 = vadd.f32 1e-05, %v422_v33  ;;  %v443_v52 = vsel %vm394_vm8, %v372_v29, %v441_v51 }
 0x3ee   :  { %v454_v57 = vrot.slane %v443_v52, %v2437_v15 }
 0x3ef   :  { %2128 = vrsqrt.f32 %v423_v34 }
 0x3fc   :  { %v2129_v36 = vpop.eup %2128 }
 0x3fd   :  { %v425_v37 = vmul.f32 %v2129_v36, %v371_v35 }
 0x3ff   :  { %v430_v38 = vrot.slane %v425_v37, %v2437_v15 }
 0x401   :  { %431 = vrot.lane.b32.xlu0 %v430_v38, %s2152_s4 }
 0x473   :  { %v432_v54 = vpop.permute.xlu0 %431 }
 0x474   :  { %v434_v55 = vsel %vm394_vm8, %v425_v37, %v432_v54 }
 0x475   :  { %v447_v56 = vrot.slane %v434_v55, %v2437_v15 }
 0x477   :  { %v448_v59 = vmul.f32 %v447_v56, %v2469_v11  ;;  %v449_v60 = vmul.f32 %v447_v56, %v2471_v12  ;;  %v450_v61 = vmul.f32 %v447_v56, %v2473_v13 }
 0x479   :  { %v455_v63 = vadd.f32 %v454_v57, %v448_v59  ;;  %v456_v1 = vadd.f32 %v454_v57, %v449_v60  ;;  %v457_v2 = vadd.f32 %v454_v57, %v450_v61 }
 0x47b   :  { %v458_v4 = vmax.f32 %v455_v63, 0.0  ;;  %v459_v5 = vmax.f32 %v456_v1, 0.0  ;;  %v460_v6 = vmax.f32 %v457_v2, 0.0 }
 0x47d   :  { %v2106_v7 = vpack.i.bf16 %v459_v5, %v458_v4  ;;  %v463_v8 = vrot.slane %v458_v4, 7  ;;  %v484_v9 = vrot.slane %v458_v4, 1  ;;  %v485_v10 = vrot.slane %v459_v5, 1 }
 0x47e   :  { %v464_v11 = vrot.slane %v459_v5, 7  ;;  %v473_v12 = vrot.slane %v460_v6, 7  ;;  %v488_v13 = vrot.slane %v460_v6, 1 }
 0x47f   :  { %2107 = vrot.lane.b32.xlu1 %v2106_v7, %s2152_s4  ;;  %v486_v14 = vsel %vm3220_vm4, %v484_v9, %v485_v10  ;;  %v492_v16 = vsel %vm3221_vm5, %v485_v10, 0.0 }
 0x480   :  { %v2111_v17 = vpack.i.bf16 %v486_v14, %v463_v8  ;;  %v474_v18 = vsel %vm3221_vm5, %v464_v11, %v473_v12  ;;  %v489_v19 = vsel %vm3220_vm4, %v485_v10, %v488_v13  ;;  %v465_v21 = vsel %vm3221_vm5, %v463_v8, %v464_v11 }
 0x481   :  { %v493_v20 = vsel %vm3219_vm6, %v492_v16, %v489_v19  ;;  %v2116_v23 = vpack.i.bf16 %v464_v11, %v465_v21  ;;  %v494_v24 = vsel %vm3218_vm7, %v488_v13, 0.0 }
 0x482   :  { %2112 = vrot.lane.b32.xlu0 %v2111_v17, %s2151_s3  ;;  %v2121_v22 = vpack.i.bf16 %v474_v18, %v493_v20 }
 0x484   :  { %2122 = vrot.lane.b32.xlu1 %v2121_v22, %s2151_s3 }
 0x486   :  { %2117 = vrot.lane.b32.xlu0 %v2116_v23, %s2151_s3 }
 0x488   :  { %510 = vrot.lane.b32.xlu1 %v494_v24, %s2151_s3 }
 0x48a   :  { %499 = vrot.lane.b32.xlu0 %v460_v6, %s2152_s4 }
 0x4f1   :  { %v2108_v25 = vpop.permute.xlu1 %2107 }
 0x4f2   :  { %v2109_v28 = vunpack.i.l.bf16 %v2108_v25  ;;  %v2110_v37 = vunpack.i.h.bf16 %v2108_v25 }
 0x4f4   :  { %v2113_v26 = vpop.permute.xlu0 %2112 }
 0x4f5   :  { %v2114_v27 = vunpack.i.l.bf16 %v2113_v26  ;;  %v2115_v29 = vunpack.i.h.bf16 %v2113_v26 }
 0x4f6   :  { %v2123_v33 = vpop.permute.xlu1 %2122 }
 0x4f7   :  { %v481_v30 = vsel %vm3221_vm5, 0.0, %v2114_v27  ;;  %v2124_v39 = vunpack.i.l.bf16 %v2123_v33  ;;  %v2125_v42 = vunpack.i.h.bf16 %v2123_v33 }
 0x4f8   :  { %v515_v31 = vsel %vm394_vm8, %v481_v30, %v2109_v28  ;;  %v2118_v32 = vpop.permute.xlu0 %2117 }
 0x4f9   :  { %v2120_v34 = vunpack.i.h.bf16 %v2118_v32  ;;  %v2119_v35 = vunpack.i.l.bf16 %v2118_v32  ;;  %v519_v36 = vsel %vm518_vm9, %v515_v31, %v2115_v29 }
 0x4fa   :  { %1985 = vmatmul.mubr.f32.vlgmr.msra.gmra.mxu0 %v519_v36  ;;  %v511_v46 = vpop.permute.xlu1 %510 }
 0x4fb   :  { %v482_v38 = vsel %vm3219_vm6, %v2119_v35, 0.0  ;;  %1987 = vmatprep.mubr.msk.f32.mxu0 %vm2149_vm0, %v2148_v0 }
 0x4fc   :  { %v500_v40 = vpop.permute.xlu0 %499  ;;  %v483_v41 = vsel %vm3218_vm7, %v482_v38, %v2120_v34  ;;  %v619_v34 = vld [vmem:[%s3199_s9] sm:$0x1]  ;;  %s2171_s9 = smov 76  }
 0x4fd   :  { %v516_v43 = vsel %vm394_vm8, %v483_v41, %v2110_v37  ;;  %v517_v45 = vsel %vm394_vm8, %v2125_v42, %v500_v40  ;;  %v719_v35 = vrot.slane %v619_v34, %v2437_v15 }
 0x4fe   :  { %v520_v44 = vsel %vm518_vm9, %v516_v43, %v2124_v39  ;;  %v521_v47 = vsel %vm518_vm9, %v517_v45, %v511_v46 }
 0x4ff   :  { %1988 = vmatmul.mubr.f32.gmra.mxu0 %v520_v44  ;;  %v618_v44 = vld [vmem:[%s3200_s8] sm:$0x1]  ;;  %s2174_s8 = smov 12  }
 0x500   :  { %1990 = vmatprep.mubr.msk.f32.mxu0 %vm2149_vm0, %v2148_v0 }
 0x503   :  { %1991 = vmatmul.mubr.f32.gmra.mxu0 %v521_v47 }
 0x504   :  { %2046 = vmatprep.mubr.msk.f32.mxu0 %vm2149_vm0, %v2148_v0 }
 0x5ba   :  { %v604_v48 = vpop.f32.mrf.mxu0 }
 0x5bb   :  { %v620_v53 = vsel %vm3224_vm2, %v604_v48, 0.0 }
 0x5bc   :  { %v1986_v49 = vpop.f32.mrf.mxu0 }
 0x5bd   :  { %v819_v49 = vld [vmem:[%s3201_s10 + $0x50] sm:$0xff] }
 0x5bf   :  { %v609_v50 = vpop.f32.mrf.mxu0 }
 0x5c0   :  { %v621_v51 = vsel %vm3224_vm2, %v609_v50, 0.0 }
 0x5c1   :  { %v1989_v52 = vpop.f32.mrf.mxu0  ;;  %v622_v54 = vadd.f32 %v621_v51, %v620_v53  ;;  %v817_v51 = vld [vmem:[%s3201_s10 + $0x40] sm:$0xff]  ;;  %v815_v53 = vld [vmem:[%s3201_s10 + $0x30] sm:$0xff] }
 0x5c2   :  { %v816_v52 = vld [vmem:[%s3201_s10 + $0x38] sm:$0xff] }
 0x5c3   :  { %v614_v55 = vpop.f32.mrf.mxu0 }
 0x5c4   :  { %v623_v56 = vsel %vm3223_vm3, %v614_v55, 0.0 }
 0x5c5   :  { %v624_v57 = vadd.f32 %v623_v56, %v622_v54  ;;  %v1992_v58 = vpop.f32.mrf.mxu0 }
 0x5c6   :  { %v814_v58 = vld [vmem:[%s3201_s10 + $0x28] sm:$0xff] }
 0x5c7   :  { %v625_v59 = vrot.slane %v624_v57, 4 }
 0x5c9   :  { %v626_v60 = vadd.f32 %v625_v59, %v624_v57 }
 0x5cb   :  { %v627_v61 = vrot.slane %v626_v60, 2 }
 0x5cd   :  { %v628_v62 = vadd.f32 %v627_v61, %v626_v60 }
 0x5cf   :  { %v629_v63 = vrot.slane %v628_v62, 1 }
 0x5d1   :  { %v630_v1 = vadd.f32 %v629_v63, %v628_v62  ;;  %v813_v62 = vld [vmem:[%s3201_s10 + $0x20] sm:$0xff] }
 0x5d3   :  { %636 = vrot.lane.b32.xlu1 %v630_v1, %s2151_s3  ;;  %632 = vrot.lane.b32.xlu0 %v630_v1, %s2153_s7 }
 0x5d7   :  { %640 = vrot.lane.b32.xlu0 %v630_v1, %s2154_s1 }
 0x645   :  { %v633_v2 = vpop.permute.xlu0 %632  ;;  %v637_v4 = vpop.permute.xlu1 %636 }
 0x646   :  { %v635_v3 = vadd.f32 %v633_v2, %v630_v1  ;;  %v812_v2 = vld [vmem:[%s3201_s10 + $0x18] sm:$0xff] }
 0x648   :  { %v639_v5 = vadd.f32 %v637_v4, %v635_v3 }
 0x649   :  { %v641_v6 = vpop.permute.xlu0 %640 }
 0x64a   :  { %v643_v7 = vadd.f32 %v641_v6, %v639_v5  ;;  %v811_v6 = vld [vmem:[%s3201_s10 + $0x10] sm:$0xff] }
 0x64c   :  { %v644_v8 = vmul.f32 0.0125, %v643_v7 }
 0x64e   :  { %649 = vrot.lane.b32.xlu0 %v644_v8, %s2152_s4  ;;  %646 = vrot.lane.b32.xlu1 %v644_v8, %s3211_s30 }
 0x652   :  { %652 = vrot.lane.b32.xlu1 %v644_v8, %s2156_s18 }
 0x6c0   :  { %v647_v9 = vpop.permute.xlu1 %646  ;;  %v650_v10 = vpop.permute.xlu0 %649 }
 0x6c1   :  { %v656_v11 = vsel %vm655_vm10, %v644_v8, %v647_v9 }
 0x6c2   :  { %v657_v12 = vsel %vm394_vm8, %v656_v11, %v650_v10 }
 0x6c4   :  { %v653_v13 = vpop.permute.xlu1 %652 }
 0x6c5   :  { %v659_v14 = vsel %vm658_vm11, %v657_v12, %v653_v13 }
 0x6c6   :  { %v663_v16 = vrot.slane %v659_v14, %v2437_v15  ;;  %v810_v14 = vld [vmem:[%s3201_s10 + $0x8] sm:$0xff] }
 0x6c8   :  { %v2607_v17 = vsub.f32 %v604_v48, %v663_v16  ;;  %v2609_v18 = vsub.f32 %v609_v50, %v663_v16  ;;  %v2611_v19 = vsub.f32 %v614_v55, %v663_v16  ;;  %v820_v48 = vld [vmem:[%s3201_s10 + $0x58] sm:$0xff]  ;;  %v818_v50 = vld [vmem:[%s3201_s10 + $0x48] sm:$0xff]  ;;  %v809_v16 = vld [vmem:[%s3201_s10] sm:$0xff]  ;;  %s2157_s10 = smov 120  }
 0x6c9   :  { %1994 = vmatpush3.msra.mxu1 %v820_v48 }
 0x6ca   :  { %v667_v20 = vmul.f32 %v2607_v17, %v2607_v17  ;;  %v668_v21 = vmul.f32 %v2609_v18, %v2609_v18  ;;  %v669_v22 = vmul.f32 %v2611_v19, %v2611_v19  ;;  %1995 = vmatprep.subr.mxu1 %v2148_v0 }
 0x6cb   :  { %1996 = vmatpush3.msra.mxu1 %v819_v49 }
 0x6cc   :  { %v670_v23 = vsel %vm3224_vm2, %v667_v20, 0.0  ;;  %v671_v24 = vsel %vm3224_vm2, %v668_v21, 0.0  ;;  %v673_v26 = vsel %vm3223_vm3, %v669_v22, 0.0  ;;  %1997 = vmatprep.subr.mxu1 %v2148_v0 }
 0x6cd   :  { %v672_v25 = vadd.f32 %v671_v24, %v670_v23  ;;  %1998 = vmatpush3.msra.mxu1 %v818_v50 }
 0x6ce   :  { %1999 = vmatprep.subr.mxu1 %v2148_v0 }
 0x6cf   :  { %v674_v27 = vadd.f32 %v673_v26, %v672_v25  ;;  %2000 = vmatpush3.msra.mxu1 %v817_v51 }
 0x6d0   :  { %2001 = vmatprep.subr.mxu1 %v2148_v0 }
 0x6d1   :  { %v675_v28 = vrot.slane %v674_v27, 4  ;;  %2002 = vmatpush3.msra.mxu1 %v816_v52 }
 0x6d2   :  { %2003 = vmatprep.subr.mxu1 %v2148_v0 }
 0x6d3   :  { %v676_v29 = vadd.f32 %v675_v28, %v674_v27  ;;  %2004 = vmatpush3.msra.mxu1 %v815_v53 }
 0x6d4   :  { %2005 = vmatprep.subr.mxu1 %v2148_v0 }
 0x6d5   :  { %v677_v30 = vrot.slane %v676_v29, 2  ;;  %2006 = vmatpush3.msra.mxu1 %v814_v58 }
 0x6d6   :  { %2007 = vmatprep.subr.mxu1 %v2148_v0 }
 0x6d7   :  { %v678_v31 = vadd.f32 %v677_v30, %v676_v29  ;;  %2008 = vmatpush3.msra.mxu1 %v813_v62 }
 0x6d8   :  { %2009 = vmatprep.subr.mxu1 %v2148_v0 }
 0x6d9   :  { %v679_v32 = vrot.slane %v678_v31, 1  ;;  %2010 = vmatpush3.msra.mxu1 %v812_v2 }
 0x6da   :  { %2011 = vmatprep.subr.mxu1 %v2148_v0 }
 0x6db   :  { %v680_v33 = vadd.f32 %v679_v32, %v678_v31  ;;  %2012 = vmatpush3.msra.mxu1 %v811_v6 }
 0x6dc   :  { %2013 = vmatprep.subr.mxu1 %v2148_v0 }
 0x6dd   :  { %686 = vrot.lane.b32.xlu1 %v680_v33, %s2151_s3  ;;  %682 = vrot.lane.b32.xlu0 %v680_v33, %s2153_s7 }
 0x6de   :  { %2014 = vmatpush3.msra.mxu1 %v810_v14 }
 0x6df   :  { %2015 = vmatprep.subr.mxu1 %v2148_v0 }
 0x6e0   :  { %2016 = vmatpush3.msra.mxu1 %v809_v16 }
 0x6e1   :  { %690 = vrot.lane.b32.xlu0 %v680_v33, %s2154_s1 }
 0x6e5   :  { %720 = vrot.lane.b32.xlu0 %v719_v35, %s3211_s30 }
 0x74f   :  { %v683_v36 = vpop.permute.xlu0 %682  ;;  %v687_v38 = vpop.permute.xlu1 %686 }
 0x750   :  { %v685_v37 = vadd.f32 %v683_v36, %v680_v33 }
 0x752   :  { %v689_v39 = vadd.f32 %v687_v38, %v685_v37 }
 0x753   :  { %v691_v40 = vpop.permute.xlu0 %690 }
 0x754   :  { %v693_v41 = vadd.f32 %v691_v40, %v689_v39 }
 0x756   :  { %v694_v42 = vmul.f32 0.0125, %v693_v41 }
 0x757   :  { %v721_v54 = vpop.permute.xlu0 %720 }
 0x758   :  { %v695_v43 = vadd.f32 1e-05, %v694_v42  ;;  %v729_v3 = vsel %vm655_vm10, %v619_v34, %v721_v54 }
 0x75a   :  { %2130 = vrsqrt.f32 %v695_v43 }
 0x767   :  { %v2131_v45 = vpop.eup %2130 }
 0x768   :  { %v697_v46 = vmul.f32 %v2131_v45, %v618_v44 }
 0x76a   :  { %v702_v47 = vrot.slane %v697_v46, %v2437_v15 }
 0x76c   :  { %706 = vrot.lane.b32.xlu0 %v702_v47, %s2152_s4  ;;  %703 = vrot.lane.b32.xlu1 %v702_v47, %s3211_s30 }
 0x770   :  { %709 = vrot.lane.b32.xlu1 %v702_v47, %s2156_s18  ;;  %726 = vrot.lane.b32.xlu0 %v719_v35, %s2156_s18 }
 0x774   :  { %723 = vrot.lane.b32.xlu1 %v719_v35, %s2152_s4 }
 0x7de   :  { %v704_v55 = vpop.permute.xlu1 %703  ;;  %v707_v57 = vpop.permute.xlu0 %706 }
 0x7df   :  { %v712_v56 = vsel %vm655_vm10, %v697_v46, %v704_v55 }
 0x7e0   :  { %v713_v59 = vsel %vm394_vm8, %v712_v56, %v707_v57 }
 0x7e2   :  { %v710_v60 = vpop.permute.xlu1 %709  ;;  %v727_v1 = vpop.permute.xlu0 %726 }
 0x7e3   :  { %v714_v61 = vsel %vm658_vm11, %v713_v59, %v710_v60 }
 0x7e4   :  { %v735_v63 = vrot.slane %v714_v61, %v2437_v15 }
 0x7e6   :  { %v724_v4 = vpop.permute.xlu1 %723  ;;  %v736_v9 = vmul.f32 %v735_v63, %v2607_v17  ;;  %v737_v10 = vmul.f32 %v735_v63, %v2609_v18  ;;  %v738_v11 = vmul.f32 %v735_v63, %v2611_v19 }
 0x7e7   :  { %v730_v5 = vsel %vm394_vm8, %v729_v3, %v724_v4 }
 0x7e8   :  { %v731_v7 = vsel %vm658_vm11, %v730_v5, %v727_v1 }
 0x7e9   :  { %v742_v8 = vrot.slane %v731_v7, %v2437_v15 }
 0x7eb   :  { %v743_v12 = vadd.f32 %v742_v8, %v736_v9  ;;  %v744_v13 = vadd.f32 %v742_v8, %v737_v10  ;;  %v745_v20 = vadd.f32 %v742_v8, %v738_v11 }
 0x7ed   :  { %v746_v17 = vmax.f32 %v743_v12, 0.0  ;;  %v747_v18 = vmax.f32 %v744_v13, 0.0  ;;  %v748_v21 = vmax.f32 %v745_v20, 0.0 }
 0x7ef   :  { %783 = vrot.lane.b32.xlu0 %v746_v17, %s3211_s30  ;;  %v751_v19 = vrot.slane %v746_v17, 7  ;;  %v752_v22 = vrot.slane %v747_v18, 7  ;;  %v772_v23 = vrot.slane %v746_v17, 1  ;;  %v773_v24 = vrot.slane %v747_v18, 1 }
 0x7f0   :  { %v776_v25 = vrot.slane %v748_v21, 1  ;;  %v761_v27 = vrot.slane %v748_v21, 7 }
 0x7f1   :  { %754 = vrot.lane.b32.xlu1 %v751_v19, %s2154_s1  ;;  %v753_v26 = vsel %vm3221_vm5, %v751_v19, %v752_v22  ;;  %v774_v28 = vsel %vm3220_vm4, %v772_v23, %v773_v24  ;;  %v780_v30 = vsel %vm3221_vm5, %v773_v24, 0.0 }
 0x7f2   :  { %v777_v29 = vsel %vm3220_vm4, %v773_v24, %v776_v25  ;;  %v762_v31 = vsel %vm3221_vm5, %v752_v22, %v761_v27  ;;  %v782_v33 = vsel %vm3218_vm7, %v776_v25, 0.0 }
 0x7f3   :  { %785 = vrot.lane.b32.xlu0 %v747_v18, %s3211_s30  ;;  %v781_v32 = vsel %vm3219_vm6, %v780_v30, %v777_v29 }
 0x7f5   :  { %763 = vrot.lane.b32.xlu1 %v752_v22, %s2154_s1 }
 0x7f7   :  { %756 = vrot.lane.b32.xlu0 %v753_v26, %s2154_s1 }
 0x7f9   :  { %794 = vrot.lane.b32.xlu1 %v774_v28, %s2154_s1 }
 0x7fb   :  { %765 = vrot.lane.b32.xlu0 %v762_v31, %s2154_s1 }
 0x7fd   :  { %796 = vrot.lane.b32.xlu1 %v781_v32, %s2154_s1 }
 0x7ff   :  { %798 = vrot.lane.b32.xlu0 %v782_v33, %s2154_s1 }
 0x801   :  { %787 = vrot.lane.b32.xlu1 %v748_v21, %s3211_s30 }
 0x861   :  { %v784_v34 = vpop.permute.xlu0 %783 }
 0x863   :  { %v755_v35 = vpop.permute.xlu1 %754 }
 0x864   :  { %v769_v38 = vsel %vm3221_vm5, 0.0, %v755_v35 }
 0x865   :  { %v786_v36 = vpop.permute.xlu0 %785  ;;  %v803_v41 = vsel %vm655_vm10, %v769_v38, %v784_v34 }
 0x867   :  { %v764_v37 = vpop.permute.xlu1 %763 }
 0x869   :  { %v757_v39 = vpop.permute.xlu0 %756 }
 0x86a   :  { %v770_v40 = vsel %vm3219_vm6, %v757_v39, 0.0 }
 0x86b   :  { %v795_v42 = vpop.permute.xlu1 %794  ;;  %v771_v43 = vsel %vm3218_vm7, %v770_v40, %v764_v37 }
 0x86c   :  { %v806_v44 = vsel %vm69_vm1, %v803_v41, %v795_v42  ;;  %v804_v47 = vsel %vm655_vm10, %v771_v43, %v786_v36 }
 0x86d   :  { %2018 = vmatmul.mubr.msk.f32.vlgmr.msra.gmra.mxu1 %vm518_vm9, %v806_v44  ;;  %v766_v45 = vpop.permute.xlu0 %765 }
 0x86e   :  { %2020 = vmatprep.mubr.msk.f32.mxu1 %vm2149_vm0, %v2148_v0 }
 0x86f   :  { %v797_v46 = vpop.permute.xlu1 %796 }
 0x870   :  { %v807_v48 = vsel %vm69_vm1, %v804_v47, %v797_v46 }
 0x871   :  { %2021 = vmatmul.mubr.msk.f32.gmra.mxu1 %vm518_vm9, %v807_v48  ;;  %v799_v50 = vpop.permute.xlu0 %798 }
 0x872   :  { %2023 = vmatprep.mubr.msk.f32.mxu1 %vm2149_vm0, %v2148_v0 }
 0x873   :  { %v788_v49 = vpop.permute.xlu1 %787 }
 0x874   :  { %v805_v51 = vsel %vm655_vm10, %v766_v45, %v788_v49 }
 0x875   :  { %v808_v52 = vsel %vm69_vm1, %v805_v51, %v799_v50 }
 0x876   :  { %2024 = vmatmul.mubr.msk.f32.gmra.mxu1 %vm518_vm9, %v808_v52  ;;  %vm3217_vm9 = vcmask 588800  }
 0x877   :  { %1818 = vmatprep.mubr.f32.mxu1 %v2148_v0 }
 0x92d   :  { %v2731_v53 = vpop.f32.mrf.mxu1 }
 0x92e   :  { %v912_v58 = vsel %vm3224_vm2, %v2731_v53, 0.0 }
 0x92f   :  { %v2019_v54 = vpop.f32.mrf.mxu1 }
 0x931   :  { %v2733_v55 = vpop.f32.mrf.mxu1 }
 0x932   :  { %v913_v56 = vsel %vm3224_vm2, %v2733_v55, 0.0 }
 0x933   :  { %v2022_v57 = vpop.f32.mrf.mxu1  ;;  %v914_v59 = vadd.f32 %v913_v56, %v912_v58 }
 0x936   :  { %v2739_v60 = vpop.f32.mrf.mxu1 }
 0x937   :  { %v915_v61 = vsel %vm3223_vm3, %v2739_v60, 0.0 }
 0x938   :  { %v916_v62 = vadd.f32 %v915_v61, %v914_v59  ;;  %v2025_v63 = vpop.f32.mrf.mxu1 }
 0x93a   :  { %v917_v1 = vrot.slane %v916_v62, 4 }
 0x93c   :  { %v918_v2 = vadd.f32 %v917_v1, %v916_v62 }
 0x93e   :  { %v919_v3 = vrot.slane %v918_v2, 2 }
 0x940   :  { %v920_v4 = vadd.f32 %v919_v3, %v918_v2 }
 0x942   :  { %v921_v5 = vrot.slane %v920_v4, 1 }
 0x944   :  { %v922_v6 = vadd.f32 %v921_v5, %v920_v4 }
 0x946   :  { %928 = vrot.lane.b32.xlu0 %v922_v6, %s2153_s7  ;;  %924 = vrot.lane.b32.xlu1 %v922_v6, %s2157_s10 }
 0x94a   :  { %936 = vrot.lane.b32.xlu0 %v922_v6, %s2151_s3  ;;  %932 = vrot.lane.b32.xlu1 %v922_v6, %s2158_s24 }
 0x94e   :  { %944 = vrot.lane.b32.xlu0 %v922_v6, %s2154_s1  ;;  %940 = vrot.lane.b32.xlu1 %v922_v6, %s2159_s25 }
 0x952   :  { %948 = vrot.lane.b32.xlu1 %v922_v6, %s2160_s27 }
 0x9b8   :  { %v929_v7 = vpop.permute.xlu0 %928  ;;  %v925_v8 = vpop.permute.xlu1 %924 }
 0x9b9   :  { %v927_v9 = vadd.f32 %v925_v8, %v922_v6 }
 0x9bb   :  { %v931_v10 = vadd.f32 %v929_v7, %v927_v9 }
 0x9bc   :  { %v937_v11 = vpop.permute.xlu0 %936  ;;  %v933_v12 = vpop.permute.xlu1 %932 }
 0x9bd   :  { %v935_v13 = vadd.f32 %v933_v12, %v931_v10  ;;  %v910_v10 = vld [vmem:[%s3203_s11] sm:$0x1]  ;;  %s2170_s11 = smov 84  }
 0x9bf   :  { %v939_v14 = vadd.f32 %v937_v11, %v935_v13 }
 0x9c0   :  { %v941_v16 = vpop.permute.xlu1 %940  ;;  %v945_v17 = vpop.permute.xlu0 %944 }
 0x9c1   :  { %v943_v20 = vadd.f32 %v941_v16, %v939_v14  ;;  %v1193_v14 = vld [vmem:[%s3204_s13 + $0x48] sm:$0xff]  ;;  %v1192_v16 = vld [vmem:[%s3204_s13 + $0x40] sm:$0xff] }
 0x9c2   :  { %2027 = vmatpush3.msra.mxu0 %v1193_v14 }
 0x9c3   :  { %v947_v18 = vadd.f32 %v945_v17, %v943_v20  ;;  %2028 = vmatprep.subr.mxu0 %v2148_v0  ;;  %v1191_v20 = vld [vmem:[%s3204_s13 + $0x38] sm:$0xff]  ;;  %v1190_v17 = vld [vmem:[%s3204_s13 + $0x30] sm:$0xff] }
 0x9c4   :  { %v949_v19 = vpop.permute.xlu1 %948  ;;  %2029 = vmatpush3.msra.mxu0 %v1192_v16 }
 0x9c5   :  { %v951_v21 = vadd.f32 %v949_v19, %v947_v18  ;;  %2030 = vmatprep.subr.mxu0 %v2148_v0 }
 0x9c6   :  { %2031 = vmatpush3.msra.mxu0 %v1191_v20 }
 0x9c7   :  { %v952_v22 = vmul.f32 0.00625, %v951_v21  ;;  %2032 = vmatprep.subr.mxu0 %v2148_v0 }
 0x9c8   :  { %2033 = vmatpush3.msra.mxu0 %v1190_v17 }
 0x9c9   :  { %957 = vrot.lane.b32.xlu1 %v952_v22, %s3211_s30  ;;  %954 = vrot.lane.b32.xlu0 %v952_v22, %s2161_s28 }
 0x9ca   :  { %2034 = vmatprep.subr.mxu0 %v2148_v0 }
 0x9cd   :  { %963 = vrot.lane.b32.xlu1 %v952_v22, %s2152_s4  ;;  %960 = vrot.lane.b32.xlu0 %v952_v22, %s3213_s29 }
 0x9d1   :  { %969 = vrot.lane.b32.xlu1 %v952_v22, %s2156_s18  ;;  %966 = vrot.lane.b32.xlu0 %v952_v22, %s2163_s2 }
 0x9d5   :  { %972 = vrot.lane.b32.xlu0 %v952_v22, %s2164_s19 }
 0xa3b   :  { %v958_v23 = vpop.permute.xlu1 %957  ;;  %v955_v24 = vpop.permute.xlu0 %954 }
 0xa3c   :  { %v976_v25 = vsel %vm975_vm12, %v952_v22, %v955_v24 }
 0xa3d   :  { %v977_v27 = vsel %vm655_vm10, %v976_v25, %v958_v23 }
 0xa3f   :  { %v964_v26 = vpop.permute.xlu1 %963  ;;  %v961_v28 = vpop.permute.xlu0 %960 }
 0xa40   :  { %v979_v29 = vsel %vm978_vm13, %v977_v27, %v961_v28 }
 0xa41   :  { %v980_v30 = vsel %vm394_vm8, %v979_v29, %v964_v26 }
 0xa43   :  { %v967_v31 = vpop.permute.xlu0 %966  ;;  %v970_v32 = vpop.permute.xlu1 %969 }
 0xa44   :  { %v982_v33 = vsel %vm981_vm14, %v980_v30, %v967_v31 }
 0xa45   :  { %v983_v34 = vsel %vm658_vm11, %v982_v33, %v970_v32 }
 0xa47   :  { %v973_v35 = vpop.permute.xlu0 %972 }
 0xa48   :  { %v985_v36 = vsel %vm984_vm15, %v983_v34, %v973_v35 }
 0xa49   :  { %v989_v37 = vrot.slane %v985_v36, %v2437_v15 }
 0xa4b   :  { %v2766_v38 = vsub.f32 %v2731_v53, %v989_v37  ;;  %v2769_v39 = vsub.f32 %v2733_v55, %v989_v37  ;;  %v2772_v40 = vsub.f32 %v2739_v60, %v989_v37  ;;  %v911_v55 = vld [vmem:[%s3202_s12] sm:$0x1]  ;;  %s2168_s12 = smov 100  }
 0xa4c   :  { %v1077_v56 = vrot.slane %v911_v55, %v2437_v15 }
 0xa4d   :  { %v993_v41 = vmul.f32 %v2766_v38, %v2766_v38  ;;  %v994_v42 = vmul.f32 %v2769_v39, %v2769_v39  ;;  %v995_v43 = vmul.f32 %v2772_v40, %v2772_v40 }
 0xa4f   :  { %v996_v44 = vsel %vm3224_vm2, %v993_v41, 0.0  ;;  %v997_v45 = vsel %vm3224_vm2, %v994_v42, 0.0  ;;  %v999_v47 = vsel %vm3223_vm3, %v995_v43, 0.0  ;;  %v1189_v41 = vld [vmem:[%s3204_s13 + $0x28] sm:$0xff] }
 0xa50   :  { %v998_v46 = vadd.f32 %v997_v45, %v996_v44  ;;  %2035 = vmatpush3.msra.mxu0 %v1189_v41 }
 0xa51   :  { %2036 = vmatprep.subr.mxu0 %v2148_v0 }
 0xa52   :  { %v1000_v48 = vadd.f32 %v999_v47, %v998_v46 }
 0xa54   :  { %v1001_v49 = vrot.slane %v1000_v48, 4 }
 0xa56   :  { %v1002_v50 = vadd.f32 %v1001_v49, %v1000_v48  ;;  %v1188_v48 = vld [vmem:[%s3204_s13 + $0x20] sm:$0xff]  ;;  %v1187_v49 = vld [vmem:[%s3204_s13 + $0x18] sm:$0xff] }
 0xa57   :  { %2037 = vmatpush3.msra.mxu0 %v1188_v48 }
 0xa58   :  { %v1003_v51 = vrot.slane %v1002_v50, 2  ;;  %2038 = vmatprep.subr.mxu0 %v2148_v0 }
 0xa59   :  { %2039 = vmatpush3.msra.mxu0 %v1187_v49 }
 0xa5a   :  { %v1004_v52 = vadd.f32 %v1003_v51, %v1002_v50  ;;  %2040 = vmatprep.subr.mxu0 %v2148_v0 }
 0xa5c   :  { %v1005_v53 = vrot.slane %v1004_v52, 1 }
 0xa5e   :  { %v1006_v54 = vadd.f32 %v1005_v53, %v1004_v52  ;;  %v1186_v53 = vld [vmem:[%s3204_s13 + $0x10] sm:$0xff] }
 0xa5f   :  { %2041 = vmatpush3.msra.mxu0 %v1186_v53 }
 0xa60   :  { %1012 = vrot.lane.b32.xlu0 %v1006_v54, %s2153_s7  ;;  %1008 = vrot.lane.b32.xlu1 %v1006_v54, %s2157_s10 }
 0xa61   :  { %2042 = vmatprep.subr.mxu0 %v2148_v0 }
 0xa64   :  { %1020 = vrot.lane.b32.xlu0 %v1006_v54, %s2151_s3  ;;  %1016 = vrot.lane.b32.xlu1 %v1006_v54, %s2158_s24 }
 0xa68   :  { %1028 = vrot.lane.b32.xlu0 %v1006_v54, %s2154_s1  ;;  %1024 = vrot.lane.b32.xlu1 %v1006_v54, %s2159_s25 }
 0xa6c   :  { %1032 = vrot.lane.b32.xlu1 %v1006_v54, %s2160_s27 }
 0xa70   :  { %1078 = vrot.lane.b32.xlu1 %v1077_v56, %s2161_s28 }
 0xa74   :  { %1081 = vrot.lane.b32.xlu1 %v1077_v56, %s3211_s30 }
 0xa78   :  { %1084 = vrot.lane.b32.xlu1 %v1077_v56, %s3213_s29 }
 0xa7c   :  { %1087 = vrot.lane.b32.xlu1 %v1077_v56, %s2152_s4 }
 0xad2   :  { %v1013_v57 = vpop.permute.xlu0 %1012  ;;  %v1009_v58 = vpop.permute.xlu1 %1008 }
 0xad3   :  { %v1011_v59 = vadd.f32 %v1009_v58, %v1006_v54 }
 0xad5   :  { %v1015_v60 = vadd.f32 %v1013_v57, %v1011_v59 }
 0xad6   :  { %v1021_v61 = vpop.permute.xlu0 %1020  ;;  %v1017_v62 = vpop.permute.xlu1 %1016 }
 0xad7   :  { %v1019_v63 = vadd.f32 %v1017_v62, %v1015_v60 }
 0xad9   :  { %v1023_v1 = vadd.f32 %v1021_v61, %v1019_v63  ;;  %v1185_v61 = vld [vmem:[%s3204_s13 + $0x8] sm:$0xff] }
 0xada   :  { %v1025_v2 = vpop.permute.xlu1 %1024  ;;  %v1029_v4 = vpop.permute.xlu0 %1028  ;;  %2043 = vmatpush3.msra.mxu0 %v1185_v61 }
 0xadb   :  { %v1027_v3 = vadd.f32 %v1025_v2, %v1023_v1  ;;  %2044 = vmatprep.subr.mxu0 %v2148_v0 }
 0xadd   :  { %v1031_v5 = vadd.f32 %v1029_v4, %v1027_v3 }
 0xade   :  { %v1033_v6 = vpop.permute.xlu1 %1032 }
 0xadf   :  { %v1035_v7 = vadd.f32 %v1033_v6, %v1031_v5 }
 0xae1   :  { %v1036_v8 = vmul.f32 0.00625, %v1035_v7 }
 0xae2   :  { %v1079_v18 = vpop.permute.xlu1 %1078 }
 0xae3   :  { %v1037_v9 = vadd.f32 1e-05, %v1036_v8  ;;  %v1099_v26 = vsel %vm975_vm12, %v911_v55, %v1079_v18 }
 0xae5   :  { %2132 = vrsqrt.f32 %v1037_v9 }
 0xae6   :  { %v1082_v19 = vpop.permute.xlu1 %1081 }
 0xae7   :  { %v1100_v30 = vsel %vm655_vm10, %v1099_v26, %v1082_v19 }
 0xaea   :  { %v1085_v22 = vpop.permute.xlu1 %1084 }
 0xaeb   :  { %v1101_v34 = vsel %vm978_vm13, %v1100_v30, %v1085_v22 }
 0xaee   :  { %v1088_v24 = vpop.permute.xlu1 %1087 }
 0xaef   :  { %v1102_v44 = vsel %vm394_vm8, %v1101_v34, %v1088_v24 }
 0xaf2   :  { %v2133_v11 = vpop.eup %2132 }
 0xaf3   :  { %v1039_v12 = vmul.f32 %v2133_v11, %v910_v10 }
 0xaf5   :  { %v1044_v13 = vrot.slane %v1039_v12, %v2437_v15 }
 0xaf7   :  { %1048 = vrot.lane.b32.xlu1 %v1044_v13, %s3211_s30  ;;  %1045 = vrot.lane.b32.xlu0 %v1044_v13, %s2161_s28 }
 0xafb   :  { %1051 = vrot.lane.b32.xlu0 %v1044_v13, %s3213_s29  ;;  %1090 = vrot.lane.b32.xlu1 %v1077_v56, %s2163_s2 }
 0xaff   :  { %1054 = vrot.lane.b32.xlu0 %v1044_v13, %s2152_s4  ;;  %1096 = vrot.lane.b32.xlu1 %v1077_v56, %s2164_s19 }
 0xb03   :  { %1057 = vrot.lane.b32.xlu0 %v1044_v13, %s2163_s2 }
 0xb07   :  { %1060 = vrot.lane.b32.xlu0 %v1044_v13, %s2156_s18 }
 0xb0b   :  { %1063 = vrot.lane.b32.xlu0 %v1044_v13, %s2164_s19 }
 0xb0f   :  { %1093 = vrot.lane.b32.xlu0 %v1077_v56, %s2156_s18 }
 0xb69   :  { %v1046_v21 = vpop.permute.xlu0 %1045  ;;  %v1049_v29 = vpop.permute.xlu1 %1048 }
 0xb6a   :  { %v1066_v28 = vsel %vm975_vm12, %v1039_v12, %v1046_v21 }
 0xb6b   :  { %v1067_v31 = vsel %vm655_vm10, %v1066_v28, %v1049_v29 }
 0xb6d   :  { %v1052_v23 = vpop.permute.xlu0 %1051  ;;  %v1091_v36 = vpop.permute.xlu1 %1090 }
 0xb6e   :  { %v1068_v33 = vsel %vm978_vm13, %v1067_v31, %v1052_v23  ;;  %v1103_v50 = vsel %vm981_vm14, %v1102_v44, %v1091_v36 }
 0xb71   :  { %v1055_v25 = vpop.permute.xlu0 %1054  ;;  %v1097_v47 = vpop.permute.xlu1 %1096 }
 0xb72   :  { %v1069_v35 = vsel %vm394_vm8, %v1068_v33, %v1055_v25 }
 0xb75   :  { %v1058_v27 = vpop.permute.xlu0 %1057 }
 0xb76   :  { %v1070_v37 = vsel %vm981_vm14, %v1069_v35, %v1058_v27 }
 0xb79   :  { %v1061_v32 = vpop.permute.xlu0 %1060 }
 0xb7a   :  { %v1071_v42 = vsel %vm658_vm11, %v1070_v37, %v1061_v32 }
 0xb7d   :  { %v1064_v43 = vpop.permute.xlu0 %1063 }
 0xb7e   :  { %v1072_v45 = vsel %vm984_vm15, %v1071_v42, %v1064_v43 }
 0xb7f   :  { %v1109_v46 = vrot.slane %v1072_v45, %v2437_v15 }
 0xb81   :  { %v1094_v51 = vpop.permute.xlu0 %1093  ;;  %v1110_v56 = vmul.f32 %v1109_v46, %v2766_v38  ;;  %v1111_v57 = vmul.f32 %v1109_v46, %v2769_v39  ;;  %v1112_v58 = vmul.f32 %v1109_v46, %v2772_v40  ;;  %v1184_v38 = vld [vmem:[%s3204_s13] sm:$0xff]  ;;  %s2165_s13 = smov 124  }
 0xb82   :  { %v1104_v52 = vsel %vm658_vm11, %v1103_v50, %v1094_v51  ;;  %2045 = vmatpush3.msra.mxu0 %v1184_v38 }
 0xb83   :  { %v1105_v54 = vsel %vm984_vm15, %v1104_v52, %v1097_v47 }
 0xb84   :  { %v1116_v55 = vrot.slane %v1105_v54, %v2437_v15 }
 0xb86   :  { %v1117_v59 = vadd.f32 %v1116_v55, %v1110_v56  ;;  %v1118_v60 = vadd.f32 %v1116_v55, %v1111_v57  ;;  %v1119_v62 = vadd.f32 %v1116_v55, %v1112_v58 }
 0xb88   :  { %v1120_v39 = vmax.f32 %v1117_v59, 0.0  ;;  %v1121_v63 = vmax.f32 %v1118_v60, 0.0  ;;  %v1122_v1 = vmax.f32 %v1119_v62, 0.0 }
 0xb8a   :  { %1157 = vrot.lane.b32.xlu1 %v1120_v39, %s2161_s28  ;;  %v1125_v40 = vrot.slane %v1120_v39, 7  ;;  %v1126_v2 = vrot.slane %v1121_v63, 7  ;;  %v1146_v3 = vrot.slane %v1120_v39, 1  ;;  %v1147_v4 = vrot.slane %v1121_v63, 1 }
 0xb8b   :  { %v1150_v5 = vrot.slane %v1122_v1, 1  ;;  %v1135_v7 = vrot.slane %v1122_v1, 7 }
 0xb8c   :  { %1128 = vrot.lane.b32.xlu0 %v1125_v40, %s2160_s27  ;;  %v1127_v6 = vsel %vm3221_vm5, %v1125_v40, %v1126_v2  ;;  %v1148_v8 = vsel %vm3220_vm4, %v1146_v3, %v1147_v4  ;;  %v1154_v10 = vsel %vm3221_vm5, %v1147_v4, 0.0 }
 0xb8d   :  { %v1151_v9 = vsel %vm3220_vm4, %v1147_v4, %v1150_v5  ;;  %v1136_v11 = vsel %vm3221_vm5, %v1126_v2, %v1135_v7  ;;  %v1156_v13 = vsel %vm3218_vm7, %v1150_v5, 0.0  ;;  %vm1419_vm4 = vcmask 359424  }
 0xb8e   :  { %1159 = vrot.lane.b32.xlu1 %v1121_v63, %s2161_s28  ;;  %v1155_v12 = vsel %vm3219_vm6, %v1154_v10, %v1151_v9 }
 0xb90   :  { %1137 = vrot.lane.b32.xlu0 %v1126_v2, %s2160_s27 }
 0xb92   :  { %1130 = vrot.lane.b32.xlu1 %v1127_v6, %s2160_s27 }
 0xb94   :  { %1168 = vrot.lane.b32.xlu0 %v1148_v8, %s2160_s27 }
 0xb96   :  { %1139 = vrot.lane.b32.xlu1 %v1136_v11, %s2160_s27 }
 0xb98   :  { %1170 = vrot.lane.b32.xlu0 %v1155_v12, %s2160_s27 }
 0xb9a   :  { %1172 = vrot.lane.b32.xlu1 %v1156_v13, %s2160_s27 }
 0xb9c   :  { %1161 = vrot.lane.b32.xlu0 %v1122_v1, %s2161_s28 }
 0xbfc   :  { %v1158_v14 = vpop.permute.xlu1 %1157 }
 0xbfe   :  { %v1129_v16 = vpop.permute.xlu0 %1128 }
 0xbff   :  { %v1143_v18 = vsel %vm3221_vm5, 0.0, %v1129_v16  ;;  %vm1422_vm5 = vcmask 424960  }
 0xc00   :  { %v1160_v20 = vpop.permute.xlu1 %1159  ;;  %v1177_v22 = vsel %vm975_vm12, %v1143_v18, %v1158_v14 }
 0xc02   :  { %v1138_v17 = vpop.permute.xlu0 %1137 }
 0xc04   :  { %v1131_v19 = vpop.permute.xlu1 %1130 }
 0xc05   :  { %v1144_v21 = vsel %vm3219_vm6, %v1131_v19, 0.0  ;;  %vm1416_vm6 = vcmask 293888  }
 0xc06   :  { %v1169_v23 = vpop.permute.xlu0 %1168  ;;  %v1145_v24 = vsel %vm3218_vm7, %v1144_v21, %v1138_v17  ;;  %vm3222_vm7 = vcmask 228352  }
 0xc07   :  { %v1181_v25 = vsel %vm3217_vm9, %v1177_v22, %v1169_v23  ;;  %v1178_v28 = vsel %vm975_vm12, %v1145_v24, %v1160_v20 }
 0xc08   :  { %2047 = vmatmul.mubr.msk.f32.vlgmr.msra.gmra.mxu0 %vm69_vm1, %v1181_v25  ;;  %v1140_v26 = vpop.permute.xlu1 %1139 }
 0xc09   :  { %2049 = vmatprep.mubr.msk.f32.mxu0 %vm2149_vm0, %v2148_v0 }
 0xc0a   :  { %v1171_v27 = vpop.permute.xlu0 %1170 }
 0xc0b   :  { %v1182_v29 = vsel %vm3217_vm9, %v1178_v28, %v1171_v27 }
 0xc0c   :  { %2050 = vmatmul.mubr.msk.f32.gmra.mxu0 %vm69_vm1, %v1182_v29  ;;  %v1173_v31 = vpop.permute.xlu1 %1172 }
 0xc0d   :  { %2052 = vmatprep.mubr.msk.f32.mxu0 %vm2149_vm0, %v2148_v0  ;;  %vm1404_vm0 = vcmask 31744  }
 0xc0e   :  { %v1162_v30 = vpop.permute.xlu0 %1161 }
 0xc0f   :  { %v1179_v32 = vsel %vm975_vm12, %v1140_v26, %v1162_v30 }
 0xc10   :  { %v1183_v33 = vsel %vm3217_vm9, %v1179_v32, %v1173_v31  ;;  %vm1410_vm9 = vcmask 162816  }
 0xc11   :  { %2053 = vmatmul.mubr.msk.f32.gmra.mxu0 %vm69_vm1, %v1183_v33  ;;  %vm1407_vm1 = vcmask 97280  }
 0xc12   :  { %1812 = vmatprep.mubr.f32.mxu0 %v2148_v0 }
 0xcc8   :  { %v2904_v34 = vpop.f32.mrf.mxu0 }
 0xcc9   :  { %v1285_v42 = vsel %vm3224_vm2, %v2904_v34, 0.0 }
 0xcca   :  { %v2048_v35 = vpop.f32.mrf.mxu0 }
 0xccc   :  { %v2906_v36 = vpop.f32.mrf.mxu0 }
 0xccd   :  { %v1286_v37 = vsel %vm3224_vm2, %v2906_v36, 0.0 }
 0xcce   :  { %v2051_v41 = vpop.f32.mrf.mxu0  ;;  %v1287_v43 = vadd.f32 %v1286_v37, %v1285_v42 }
 0xcd1   :  { %v2912_v44 = vpop.f32.mrf.mxu0 }
 0xcd2   :  { %v1288_v45 = vsel %vm3223_vm3, %v2912_v44, 0.0 }
 0xcd3   :  { %v1289_v46 = vadd.f32 %v1288_v45, %v1287_v43  ;;  %v2054_v47 = vpop.f32.mrf.mxu0 }
 0xcd5   :  { %v1290_v48 = vrot.slane %v1289_v46, 4 }
 0xcd7   :  { %v1291_v49 = vadd.f32 %v1290_v48, %v1289_v46 }
 0xcd9   :  { %v1292_v50 = vrot.slane %v1291_v49, 2 }
 0xcdb   :  { %v1293_v51 = vadd.f32 %v1292_v50, %v1291_v49 }
 0xcdd   :  { %v1294_v52 = vrot.slane %v1293_v51, 1 }
 0xcdf   :  { %v1295_v53 = vadd.f32 %v1294_v52, %v1293_v51 }
 0xce1   :  { %1301 = vrot.lane.b32.xlu1 %v1295_v53, %s2157_s10  ;;  %1297 = vrot.lane.b32.xlu0 %v1295_v53, %s2165_s13 }
 0xce5   :  { %1309 = vrot.lane.b32.xlu1 %v1295_v53, %s2153_s7  ;;  %1305 = vrot.lane.b32.xlu0 %v1295_v53, %s2166_s6 }
 0xce9   :  { %1317 = vrot.lane.b32.xlu1 %v1295_v53, %s2158_s24  ;;  %1313 = vrot.lane.b32.xlu0 %v1295_v53, %s2167_s0 }
 0xced   :  { %1325 = vrot.lane.b32.xlu1 %v1295_v53, %s2151_s3  ;;  %1321 = vrot.lane.b32.xlu0 %v1295_v53, %s2168_s12 }
 0xcf1   :  { %1333 = vrot.lane.b32.xlu1 %v1295_v53, %s2159_s25  ;;  %1329 = vrot.lane.b32.xlu0 %v1295_v53, %s2169_s20 }
 0xcf5   :  { %1341 = vrot.lane.b32.xlu1 %v1295_v53, %s2154_s1  ;;  %1337 = vrot.lane.b32.xlu0 %v1295_v53, %s2170_s11 }
 0xcf9   :  { %1349 = vrot.lane.b32.xlu1 %v1295_v53, %s2160_s27  ;;  %1345 = vrot.lane.b32.xlu0 %v1295_v53, %s2171_s9 }
 0xcfd   :  { %1353 = vrot.lane.b32.xlu0 %v1295_v53, %s2172_s26 }
 0xd53   :  { %v1302_v54 = vpop.permute.xlu1 %1301  ;;  %v1298_v55 = vpop.permute.xlu0 %1297 }
 0xd54   :  { %v1300_v56 = vadd.f32 %v1298_v55, %v1295_v53 }
 0xd56   :  { %v1304_v57 = vadd.f32 %v1302_v54, %v1300_v56 }
 0xd57   :  { %v1310_v58 = vpop.permute.xlu1 %1309  ;;  %v1306_v59 = vpop.permute.xlu0 %1305 }
 0xd58   :  { %v1308_v60 = vadd.f32 %v1306_v59, %v1304_v57 }
 0xd5a   :  { %v1312_v61 = vadd.f32 %v1310_v58, %v1308_v60 }
 0xd5b   :  { %v1318_v38 = vpop.permute.xlu1 %1317  ;;  %v1314_v62 = vpop.permute.xlu0 %1313 }
 0xd5c   :  { %v1316_v39 = vadd.f32 %v1314_v62, %v1312_v61 }
 0xd5e   :  { %v1320_v63 = vadd.f32 %v1318_v38, %v1316_v39 }
 0xd5f   :  { %v1326_v40 = vpop.permute.xlu1 %1325  ;;  %v1322_v1 = vpop.permute.xlu0 %1321 }
 0xd60   :  { %v1324_v2 = vadd.f32 %v1322_v1, %v1320_v63 }
 0xd62   :  { %v1328_v3 = vadd.f32 %v1326_v40, %v1324_v2 }
 0xd63   :  { %v1334_v4 = vpop.permute.xlu1 %1333  ;;  %v1330_v5 = vpop.permute.xlu0 %1329 }
 0xd64   :  { %v1332_v6 = vadd.f32 %v1330_v5, %v1328_v3  ;;  %v2997_v5 = vld [vmem:[%s3205_s15] sm:$0x1]  ;;  %s3230_s15 = smov 20  }
 0xd66   :  { %v1336_v7 = vadd.f32 %v1334_v4, %v1332_v6  ;;  %v3002_v6 = vrot.slane %v2997_v5, %v2437_v15 }
 0xd67   :  { %v1342_v8 = vpop.permute.xlu1 %1341  ;;  %v1338_v9 = vpop.permute.xlu0 %1337 }
 0xd68   :  { %v1340_v10 = vadd.f32 %v1338_v9, %v1336_v7 }
 0xd6a   :  { %v1344_v11 = vadd.f32 %v1342_v8, %v1340_v10 }
 0xd6b   :  { %v1346_v12 = vpop.permute.xlu0 %1345  ;;  %v1350_v14 = vpop.permute.xlu1 %1349 }
 0xd6c   :  { %v1348_v13 = vadd.f32 %v1346_v12, %v1344_v11 }
 0xd6e   :  { %v1352_v16 = vadd.f32 %v1350_v14, %v1348_v13 }
 0xd6f   :  { %v1354_v20 = vpop.permute.xlu0 %1353 }
 0xd70   :  { %v1356_v17 = vadd.f32 %v1354_v20, %v1352_v16 }
 0xd72   :  { %v1357_v18 = vmul.f32 0.003125, %v1356_v17 }
 0xd74   :  { %1362 = vrot.lane.b32.xlu0 %v1357_v18, %s2161_s28  ;;  %1359 = vrot.lane.b32.xlu1 %v1357_v18, %s2173_s21 }
 0xd78   :  { %1368 = vrot.lane.b32.xlu0 %v1357_v18, %s3211_s30  ;;  %1365 = vrot.lane.b32.xlu1 %v1357_v18, %s2174_s8  ;;  %s2178_s30 = smov 44  }
 0xd7c   :  { %1374 = vrot.lane.b32.xlu0 %v1357_v18, %s3213_s29  ;;  %1371 = vrot.lane.b32.xlu1 %v1357_v18, %s3215_s22  ;;  %s2179_s29 = smov 52   ;;  %s2180_s22 = smov 60  }
 0xd80   :  { %1380 = vrot.lane.b32.xlu0 %v1357_v18, %s2152_s4  ;;  %1377 = vrot.lane.b32.xlu1 %v1357_v18, %s2176_s5 }
 0xd84   :  { %1386 = vrot.lane.b32.xlu0 %v1357_v18, %s2163_s2  ;;  %1383 = vrot.lane.b32.xlu1 %v1357_v18, %s2177_s23 }
 0xd88   :  { %1392 = vrot.lane.b32.xlu0 %v1357_v18, %s2156_s18  ;;  %1389 = vrot.lane.b32.xlu1 %v1357_v18, %s2178_s30 }
 0xd8c   :  { %1398 = vrot.lane.b32.xlu0 %v1357_v18, %s2164_s19  ;;  %1395 = vrot.lane.b32.xlu1 %v1357_v18, %s2179_s29 }
 0xd90   :  { %1401 = vrot.lane.b32.xlu1 %v1357_v18, %s2180_s22 }
 0xde6   :  { %v1363_v19 = vpop.permute.xlu0 %1362  ;;  %v1360_v21 = vpop.permute.xlu1 %1359 }
 0xde7   :  { %v1405_v22 = vsel %vm1404_vm0, %v1357_v18, %v1360_v21 }
 0xde8   :  { %v1406_v24 = vsel %vm975_vm12, %v1405_v22, %v1363_v19 }
 0xdea   :  { %v1369_v23 = vpop.permute.xlu0 %1368  ;;  %v1366_v25 = vpop.permute.xlu1 %1365 }
 0xdeb   :  { %v1408_v26 = vsel %vm1407_vm1, %v1406_v24, %v1366_v25 }
 0xdec   :  { %v1409_v28 = vsel %vm655_vm10, %v1408_v26, %v1369_v23 }
 0xdee   :  { %v1375_v27 = vpop.permute.xlu0 %1374  ;;  %v1372_v29 = vpop.permute.xlu1 %1371 }
 0xdef   :  { %v1411_v30 = vsel %vm1410_vm9, %v1409_v28, %v1372_v29 }
 0xdf0   :  { %v1412_v32 = vsel %vm978_vm13, %v1411_v30, %v1375_v27 }
 0xdf2   :  { %v1381_v31 = vpop.permute.xlu0 %1380  ;;  %v1378_v33 = vpop.permute.xlu1 %1377 }
 0xdf3   :  { %v1414_v35 = vsel %vm3222_vm7, %v1412_v32, %v1378_v33  ;;  %vm1425_vm7 = vcmask 490496  }
 0xdf4   :  { %v1415_v41 = vsel %vm394_vm8, %v1414_v35, %v1381_v31 }
 0xdf6   :  { %v1387_v37 = vpop.permute.xlu0 %1386  ;;  %v1384_v42 = vpop.permute.xlu1 %1383 }
 0xdf7   :  { %v1417_v43 = vsel %vm1416_vm6, %v1415_v41, %v1384_v42 }
 0xdf8   :  { %v1418_v46 = vsel %vm981_vm14, %v1417_v43, %v1387_v37 }
 0xdfa   :  { %v1393_v45 = vpop.permute.xlu0 %1392  ;;  %v1390_v47 = vpop.permute.xlu1 %1389 }
 0xdfb   :  { %v1420_v48 = vsel %vm1419_vm4, %v1418_v46, %v1390_v47  ;;  %v1283_v46 = vld [vmem:[%s3206_s14] sm:$0x1] }
 0xdfc   :  { %v1421_v49 = vsel %vm658_vm11, %v1420_v48, %v1393_v45 }
 0xdfe   :  { %v1396_v50 = vpop.permute.xlu1 %1395  ;;  %v1399_v51 = vpop.permute.xlu0 %1398 }
 0xdff   :  { %v1423_v52 = vsel %vm1422_vm5, %v1421_v49, %v1396_v50  ;;  %v1738_v50 = vld [vmem:[%s3207_s16 + $0x88] sm:$0xff] }
 0xe00   :  { %v1424_v53 = vsel %vm984_vm15, %v1423_v52, %v1399_v51  ;;  %v1737_v51 = vld [vmem:[%s3207_s16 + $0x80] sm:$0xff]  ;;  %v1736_v52 = vld [vmem:[%s3207_s16 + $0x78] sm:$0xff]  ;;  %2055 = vmatprep.subr.mxu1 %v1738_v50  ;;  %1762 = vmatprep.subr.mxu0 %v1738_v50 }
 0xe01   :  { %2064 = vmatpush1.msra.mxu1 %v1737_v51  ;;  %1763 = vmatpush1.msra.mxu0 %v1737_v51  ;;  %v1733_v51 = vld [vmem:[%s3207_s16 + $0x60] sm:$0xff] }
 0xe02   :  { %v1402_v54 = vpop.permute.xlu1 %1401  ;;  %2056 = vmatprep.subr.mxu1 %v1736_v52  ;;  %1764 = vmatprep.subr.mxu0 %v1736_v52  ;;  %v1732_v52 = vld [vmem:[%s3207_s16 + $0x58] sm:$0xff] }
 0xe03   :  { %v1426_v55 = vsel %vm1425_vm7, %v1424_v53, %v1402_v54 }
 0xe04   :  { %v1430_v56 = vrot.slane %v1426_v55, %v2437_v15 }
 0xe06   :  { %v2963_v57 = vsub.f32 %v2904_v34, %v1430_v56  ;;  %v2966_v58 = vsub.f32 %v2906_v36, %v1430_v56  ;;  %v2969_v59 = vsub.f32 %v2912_v44, %v1430_v56 }
 0xe08   :  { %v1434_v60 = vmul.f32 %v2963_v57, %v2963_v57  ;;  %v1435_v61 = vmul.f32 %v2966_v58, %v2966_v58  ;;  %v1436_v38 = vmul.f32 %v2969_v59, %v2969_v59 }
 0xe0a   :  { %v1437_v62 = vsel %vm3224_vm2, %v1434_v60, 0.0  ;;  %v1438_v34 = vsel %vm3224_vm2, %v1435_v61, 0.0  ;;  %v1440_v36 = vsel %vm3223_vm3, %v1436_v38, 0.0  ;;  %vm3232_vm3 = vcmask 228352  }
 0xe0b   :  { %v1439_v39 = vadd.f32 %v1438_v34, %v1437_v62  ;;  %vm3233_vm2 = vmmov %vm3232_vm3 }
 0xe0d   :  { %v1441_v63 = vadd.f32 %v1440_v36, %v1439_v39 }
 0xe0f   :  { %v1442_v40 = vrot.slane %v1441_v63, 4 }
 0xe11   :  { %v1443_v44 = vadd.f32 %v1442_v40, %v1441_v63 }
 0xe13   :  { %v1444_v1 = vrot.slane %v1443_v44, 2 }
 0xe15   :  { %v1445_v2 = vadd.f32 %v1444_v1, %v1443_v44 }
 0xe17   :  { %v1446_v3 = vrot.slane %v1445_v2, 1 }
 0xe19   :  { %v1447_v4 = vadd.f32 %v1446_v3, %v1445_v2 }
 0xe1b   :  { %1453 = vrot.lane.b32.xlu1 %v1447_v4, %s2157_s10  ;;  %1449 = vrot.lane.b32.xlu0 %v1447_v4, %s2165_s13 }
 0xe1f   :  { %1461 = vrot.lane.b32.xlu1 %v1447_v4, %s2153_s7  ;;  %1457 = vrot.lane.b32.xlu0 %v1447_v4, %s2166_s6 }
 0xe23   :  { %1469 = vrot.lane.b32.xlu1 %v1447_v4, %s2158_s24  ;;  %1465 = vrot.lane.b32.xlu0 %v1447_v4, %s2167_s0 }
 0xe27   :  { %1477 = vrot.lane.b32.xlu1 %v1447_v4, %s2151_s3  ;;  %1473 = vrot.lane.b32.xlu0 %v1447_v4, %s2168_s12  ;;  %s3229_s3 = smov 16  }
 0xe2b   :  { %1485 = vrot.lane.b32.xlu1 %v1447_v4, %s2159_s25  ;;  %1481 = vrot.lane.b32.xlu0 %v1447_v4, %s2169_s20 }
 0xe2f   :  { %1493 = vrot.lane.b32.xlu1 %v1447_v4, %s2154_s1  ;;  %1489 = vrot.lane.b32.xlu0 %v1447_v4, %s2170_s11  ;;  %s3231_s1 = smov 24  }
 0xe33   :  { %1501 = vrot.lane.b32.xlu1 %v1447_v4, %s2160_s27  ;;  %1497 = vrot.lane.b32.xlu0 %v1447_v4, %s2171_s9 }
 0xe37   :  { %1505 = vrot.lane.b32.xlu0 %v1447_v4, %s2172_s26 }
 0xe3b   :  { %1583 = vrot.lane.b32.xlu0 %v3002_v6, %s2173_s21 }
 0xe3f   :  { %1586 = vrot.lane.b32.xlu0 %v3002_v6, %s2161_s28 }
 0xe43   :  { %1589 = vrot.lane.b32.xlu0 %v3002_v6, %s2174_s8 }
 0xe47   :  { %1592 = vrot.lane.b32.xlu0 %v3002_v6, %s3229_s3 }
 0xe4b   :  { %1595 = vrot.lane.b32.xlu0 %v3002_v6, %s3230_s15 }
 0xe4f   :  { %1598 = vrot.lane.b32.xlu0 %v3002_v6, %s3231_s1 }
 0xe53   :  { %1601 = vrot.lane.b32.xlu0 %v3002_v6, %s2176_s5 }
 0xe57   :  { %1604 = vrot.lane.b32.xlu0 %v3002_v6, %s2152_s4 }
 0xe5b   :  { %1607 = vrot.lane.b32.xlu0 %v3002_v6, %s2177_s23 }
 0xe5f   :  { %1610 = vrot.lane.b32.xlu0 %v3002_v6, %s2163_s2 }
 0xe8d   :  { %v1454_v7 = vpop.permute.xlu1 %1453  ;;  %v1450_v8 = vpop.permute.xlu0 %1449 }
 0xe8e   :  { %v1452_v9 = vadd.f32 %v1450_v8, %v1447_v4 }
 0xe90   :  { %v1456_v10 = vadd.f32 %v1454_v7, %v1452_v9 }
 0xe91   :  { %v1462_v11 = vpop.permute.xlu1 %1461  ;;  %v1458_v12 = vpop.permute.xlu0 %1457 }
 0xe92   :  { %v1460_v13 = vadd.f32 %v1458_v12, %v1456_v10 }
 0xe94   :  { %v1464_v14 = vadd.f32 %v1462_v11, %v1460_v13 }
 0xe95   :  { %v1470_v16 = vpop.permute.xlu1 %1469  ;;  %v1466_v20 = vpop.permute.xlu0 %1465 }
 0xe96   :  { %v1468_v17 = vadd.f32 %v1466_v20, %v1464_v14 }
 0xe98   :  { %v1472_v18 = vadd.f32 %v1470_v16, %v1468_v17 }
 0xe99   :  { %v1478_v19 = vpop.permute.xlu1 %1477  ;;  %v1474_v21 = vpop.permute.xlu0 %1473 }
 0xe9a   :  { %v1476_v22 = vadd.f32 %v1474_v21, %v1472_v18 }
 0xe9c   :  { %v1480_v23 = vadd.f32 %v1478_v19, %v1476_v22 }
 0xe9d   :  { %v1486_v24 = vpop.permute.xlu1 %1485  ;;  %v1482_v25 = vpop.permute.xlu0 %1481 }
 0xe9e   :  { %v1484_v26 = vadd.f32 %v1482_v25, %v1480_v23 }
 0xea0   :  { %v1488_v27 = vadd.f32 %v1486_v24, %v1484_v26 }
 0xea1   :  { %v1494_v28 = vpop.permute.xlu1 %1493  ;;  %v1490_v29 = vpop.permute.xlu0 %1489 }
 0xea2   :  { %v1492_v30 = vadd.f32 %v1490_v29, %v1488_v27 }
 0xea4   :  { %v1496_v31 = vadd.f32 %v1494_v28, %v1492_v30 }
 0xea5   :  { %v1498_v32 = vpop.permute.xlu0 %1497  ;;  %v1502_v35 = vpop.permute.xlu1 %1501 }
 0xea6   :  { %v1500_v33 = vadd.f32 %v1498_v32, %v1496_v31 }
 0xea8   :  { %v1504_v37 = vadd.f32 %v1502_v35, %v1500_v33 }
 0xea9   :  { %v1506_v41 = vpop.permute.xlu0 %1505 }
 0xeaa   :  { %v1508_v42 = vadd.f32 %v1506_v41, %v1504_v37 }
 0xeac   :  { %v1509_v43 = vmul.f32 0.003125, %v1508_v42 }
 0xead   :  { %v1584_v53 = vpop.permute.xlu0 %1583 }
 0xeae   :  { %v1510_v45 = vadd.f32 1e-05, %v1509_v43  ;;  %v1628_v44 = vsel %vm1404_vm0, %v2997_v5, %v1584_v53 }
 0xeb0   :  { %2134 = vrsqrt.f32 %v1510_v45  ;;  %v1735_v45 = vld [vmem:[%s3207_s16 + $0x70] sm:$0xff] }
 0xeb1   :  { %v1587_v54 = vpop.permute.xlu0 %1586  ;;  %2065 = vmatpush1.msra.mxu1 %v1735_v45  ;;  %1765 = vmatpush1.msra.mxu0 %v1735_v45 }
 0xeb2   :  { %v1629_v3 = vsel %vm975_vm12, %v1628_v44, %v1587_v54 }
 0xeb5   :  { %v1590_v55 = vpop.permute.xlu0 %1589 }
 0xeb9   :  { %v1593_v56 = vpop.permute.xlu0 %1592 }
 0xebd   :  { %v2135_v47 = vpop.eup %2134  ;;  %v1596_v60 = vpop.permute.xlu0 %1595 }
 0xebe   :  { %v1512_v48 = vmul.f32 %v2135_v47, %v1283_v46  ;;  %v1734_v46 = vld [vmem:[%s3207_s16 + $0x68] sm:$0xff] }
 0xebf   :  { %2057 = vmatprep.subr.mxu1 %v1734_v46  ;;  %1766 = vmatprep.subr.mxu0 %v1734_v46 }
 0xec0   :  { %v1517_v49 = vrot.slane %v1512_v48, %v2437_v15  ;;  %2066 = vmatpush1.msra.mxu1 %v1733_v51  ;;  %1767 = vmatpush1.msra.mxu0 %v1733_v51 }
 0xec1   :  { %v1599_v38 = vpop.permute.xlu0 %1598  ;;  %2058 = vmatprep.subr.mxu1 %v1732_v52  ;;  %1768 = vmatprep.subr.mxu0 %v1732_v52 }
 0xec2   :  { %1521 = vrot.lane.b32.xlu0 %v1517_v49, %s2161_s28  ;;  %1518 = vrot.lane.b32.xlu1 %v1517_v49, %s2173_s21 }
 0xec5   :  { %v1602_v39 = vpop.permute.xlu0 %1601 }
 0xec6   :  { %1524 = vrot.lane.b32.xlu1 %v1517_v49, %s2174_s8  ;;  %1613 = vrot.lane.b32.xlu0 %v3002_v6, %s2178_s30 }
 0xec9   :  { %v1605_v63 = vpop.permute.xlu0 %1604 }
 0xeca   :  { %1527 = vrot.lane.b32.xlu1 %v1517_v49, %s3229_s3  ;;  %1616 = vrot.lane.b32.xlu0 %v3002_v6, %s2156_s18 }
 0xecd   :  { %v1608_v2 = vpop.permute.xlu0 %1607 }
 0xece   :  { %1530 = vrot.lane.b32.xlu1 %v1517_v49, %s3230_s15  ;;  %1619 = vrot.lane.b32.xlu0 %v3002_v6, %s2179_s29 }
 0xed1   :  { %v1611_v7 = vpop.permute.xlu0 %1610 }
 0xed2   :  { %1533 = vrot.lane.b32.xlu1 %v1517_v49, %s3231_s1  ;;  %1625 = vrot.lane.b32.xlu0 %v3002_v6, %s2180_s22 }
 0xed6   :  { %1536 = vrot.lane.b32.xlu1 %v1517_v49, %s2176_s5 }
 0xeda   :  { %1539 = vrot.lane.b32.xlu1 %v1517_v49, %s2152_s4 }
 0xede   :  { %1542 = vrot.lane.b32.xlu1 %v1517_v49, %s2177_s23 }
 0xee2   :  { %1545 = vrot.lane.b32.xlu1 %v1517_v49, %s2163_s2 }
 0xee6   :  { %1548 = vrot.lane.b32.xlu1 %v1517_v49, %s2178_s30 }
 0xeea   :  { %1551 = vrot.lane.b32.xlu1 %v1517_v49, %s2156_s18 }
 0xeee   :  { %1554 = vrot.lane.b32.xlu1 %v1517_v49, %s2179_s29 }
 0xef2   :  { %1557 = vrot.lane.b32.xlu1 %v1517_v49, %s2164_s19 }
 0xef6   :  { %1560 = vrot.lane.b32.xlu1 %v1517_v49, %s2180_s22 }
 0xefa   :  { %1622 = vrot.lane.b32.xlu1 %v3002_v6, %s2164_s19  ;;  %v1630_v6 = vsel %vm1407_vm1, %v1629_v3, %v1590_v55  ;;  %v1727_v3 = vld [vmem:[%s3207_s16 + $0x30] sm:$0xff] }
 0xefb   :  { %v1631_v9 = vsel %vm655_vm10, %v1630_v6, %v1593_v56 }
 0xefc   :  { %v1632_v10 = vsel %vm1410_vm9, %v1631_v9, %v1596_v60  ;;  %v1731_v60 = vld [vmem:[%s3207_s16 + $0x50] sm:$0xff] }
 0xefd   :  { %v1633_v13 = vsel %vm978_vm13, %v1632_v10, %v1599_v38  ;;  %2067 = vmatpush1.msra.mxu1 %v1731_v60  ;;  %1769 = vmatpush1.msra.mxu0 %v1731_v60 }
 0xefe   :  { %v1634_v16 = vsel %vm3232_vm3, %v1633_v13, %v1602_v39 }
 0xeff   :  { %v1635_v19 = vsel %vm394_vm8, %v1634_v16, %v1605_v63 }
 0xf00   :  { %v1636_v24 = vsel %vm1416_vm6, %v1635_v19, %v1608_v2 }
 0xf01   :  { %v1637_v30 = vsel %vm981_vm14, %v1636_v24, %v1611_v7  ;;  %v1723_v7 = vld [vmem:[%s3207_s16 + $0x10] sm:$0xff] }
 0xf34   :  { %v1519_v61 = vpop.permute.xlu1 %1518  ;;  %v1522_v12 = vpop.permute.xlu0 %1521 }
 0xf35   :  { %v1563_v5 = vsel %vm1404_vm0, %v1512_v48, %v1519_v61  ;;  %v1730_v61 = vld [vmem:[%s3207_s16 + $0x48] sm:$0xff] }
 0xf36   :  { %v1564_v17 = vsel %vm975_vm12, %v1563_v5, %v1522_v12  ;;  %2059 = vmatprep.subr.mxu1 %v1730_v61  ;;  %1770 = vmatprep.subr.mxu0 %v1730_v61  ;;  %vm1717_vm12 = vcmask 556032  }
 0xf38   :  { %v1525_v62 = vpop.permute.xlu1 %1524  ;;  %v1614_v20 = vpop.permute.xlu0 %1613 }
 0xf39   :  { %v1565_v21 = vsel %vm1407_vm1, %v1564_v17, %v1525_v62  ;;  %v1638_v37 = vsel %vm1419_vm4, %v1637_v30, %v1614_v20  ;;  %v1729_v62 = vld [vmem:[%s3207_s16 + $0x40] sm:$0xff] }
 0xf3a   :  { %2068 = vmatpush1.msra.mxu1 %v1729_v62  ;;  %1771 = vmatpush1.msra.mxu0 %v1729_v62 }
 0xf3c   :  { %v1528_v34 = vpop.permute.xlu1 %1527  ;;  %v1617_v27 = vpop.permute.xlu0 %1616 }
 0xf3d   :  { %v1566_v22 = vsel %vm655_vm10, %v1565_v21, %v1528_v34  ;;  %v1639_v49 = vsel %vm658_vm11, %v1638_v37, %v1617_v27  ;;  %v1728_v34 = vld [vmem:[%s3207_s16 + $0x38] sm:$0xff] }
 0xf3e   :  { %2060 = vmatprep.subr.mxu1 %v1728_v34  ;;  %1772 = vmatprep.subr.mxu0 %v1728_v34 }
 0xf3f   :  { %2069 = vmatpush1.msra.mxu1 %v1727_v3  ;;  %1773 = vmatpush1.msra.mxu0 %v1727_v3 }
 0xf40   :  { %v1531_v36 = vpop.permute.xlu1 %1530  ;;  %v1620_v42 = vpop.permute.xlu0 %1619 }
 0xf41   :  { %v1567_v23 = vsel %vm1410_vm9, %v1566_v22, %v1531_v36  ;;  %v1640_v55 = vsel %vm1422_vm5, %v1639_v49, %v1620_v42 }
 0xf44   :  { %v1534_v40 = vpop.permute.xlu1 %1533  ;;  %v1626_v54 = vpop.permute.xlu0 %1625 }
 0xf45   :  { %v1568_v25 = vsel %vm978_vm13, %v1567_v23, %v1534_v40 }
 0xf48   :  { %v1537_v1 = vpop.permute.xlu1 %1536 }
 0xf49   :  { %v1569_v28 = vsel %vm3233_vm2, %v1568_v25, %v1537_v1  ;;  %vm3234_vm2 = vcmask 1040384  }
 0xf4a   :  { %vm3235_vm3 = vmmov %vm3234_vm2 }
 0xf4b   :  { %vm3243_vm13 = vmmov %vm3234_vm2 }
 0xf4c   :  { %v1540_v4 = vpop.permute.xlu1 %1539 }
 0xf4d   :  { %v1570_v29 = vsel %vm394_vm8, %v1569_v28, %v1540_v4  ;;  %vm3240_vm8 = vcmask 1042432  }
 0xf50   :  { %v1543_v8 = vpop.permute.xlu1 %1542 }
 0xf51   :  { %v1571_v31 = vsel %vm1416_vm6, %v1570_v29, %v1543_v8  ;;  %v1722_v8 = vld [vmem:[%s3207_s16 + $0x8] sm:$0xff]  ;;  %vm3238_vm6 = vcmask 1041408  }
 0xf52   :  { %vm3241_vm10 = vmmov %vm3238_vm6 }
 0xf54   :  { %v1546_v11 = vpop.permute.xlu1 %1545 }
 0xf55   :  { %v1572_v32 = vsel %vm981_vm14, %v1571_v31, %v1546_v11  ;;  %v1721_v11 = vld [vmem:[%s3207_s16] sm:$0xff]  ;;  %vm3244_vm14 = vcmask 588800  }
 0xf56   :  { %vm3246_vm9 = vmmov %vm3244_vm14 }
 0xf58   :  { %v1549_v14 = vpop.permute.xlu1 %1548 }
 0xf59   :  { %v1573_v35 = vsel %vm1419_vm4, %v1572_v32, %v1549_v14  ;;  %vm3236_vm4 = vcmask 1046528  }
 0xf5c   :  { %v1552_v18 = vpop.permute.xlu1 %1551 }
 0xf5d   :  { %v1574_v41 = vsel %vm658_vm11, %v1573_v35, %v1552_v18  ;;  %vm3242_vm11 = vmmov %vm3240_vm8 }
 0xf60   :  { %v1555_v26 = vpop.permute.xlu1 %1554 }
 0xf61   :  { %v1575_v43 = vsel %vm1422_vm5, %v1574_v41, %v1555_v26  ;;  %vm3237_vm5 = vmmov %vm3234_vm2 }
 0xf64   :  { %v1558_v33 = vpop.permute.xlu1 %1557 }
 0xf65   :  { %v1576_v47 = vsel %vm984_vm15, %v1575_v43, %v1558_v33 }
 0xf68   :  { %v1561_v48 = vpop.permute.xlu1 %1560 }
 0xf69   :  { %v1577_v50 = vsel %vm1425_vm7, %v1576_v47, %v1561_v48 }
 0xf6a   :  { %v1646_v53 = vrot.slane %v1577_v50, %v2437_v15 }
 0xf6c   :  { %v1623_v56 = vpop.permute.xlu1 %1622  ;;  %v1647_v36 = vmul.f32 %v1646_v53, %v2963_v57  ;;  %v1648_v63 = vmul.f32 %v1646_v53, %v2966_v58  ;;  %v1649_v44 = vmul.f32 %v1646_v53, %v2969_v59  ;;  %v1726_v57 = vld [vmem:[%s3207_s16 + $0x28] sm:$0xff]  ;;  %v1724_v58 = vld [vmem:[%s3207_s16 + $0x18] sm:$0xff] }
 0xf6d   :  { %v1641_v38 = vsel %vm984_vm15, %v1640_v55, %v1623_v56  ;;  %2061 = vmatprep.subr.mxu1 %v1726_v57  ;;  %1774 = vmatprep.subr.mxu0 %v1726_v57  ;;  %vm3245_vm15 = vmmov %vm3244_vm14 }
 0xf6e   :  { %v1642_v39 = vsel %vm1425_vm7, %v1641_v38, %v1626_v54  ;;  %vm3239_vm7 = vmmov %vm3236_vm4 }
 0xf6f   :  { %v1653_v40 = vrot.slane %v1642_v39, %v2437_v15  ;;  %v1725_v15 = vld [vmem:[%s3207_s16 + $0x20] sm:$0xff] }
 0xf70   :  { %2070 = vmatpush1.msra.mxu1 %v1725_v15  ;;  %1775 = vmatpush1.msra.mxu0 %v1725_v15 }
 0xf71   :  { %v1654_v1 = vadd.f32 %v1653_v40, %v1647_v36  ;;  %v1655_v2 = vadd.f32 %v1653_v40, %v1648_v63  ;;  %v1656_v4 = vadd.f32 %v1653_v40, %v1649_v44  ;;  %2062 = vmatprep.subr.mxu1 %v1724_v58  ;;  %1776 = vmatprep.subr.mxu0 %v1724_v58 }
 0xf72   :  { %2071 = vmatpush1.msra.mxu1 %v1723_v7  ;;  %1777 = vmatpush1.msra.mxu0 %v1723_v7 }
 0xf73   :  { %v1657_v59 = vmax.f32 %v1654_v1, 0.0  ;;  %v1658_v6 = vmax.f32 %v1655_v2, 0.0  ;;  %v1659_v10 = vmax.f32 %v1656_v4, 0.0  ;;  %2063 = vmatprep.subr.mxu1 %v1722_v8  ;;  %1778 = vmatprep.subr.mxu0 %v1722_v8 }
 0xf74   :  { %2072 = vmatpush1.msra.mxu1 %v1721_v11  ;;  %1779 = vmatpush1.msra.mxu0 %v1721_v11 }
 0xf75   :  { %1696 = vrot.lane.b32.xlu1 %v1658_v6, %s2173_s21  ;;  %v1663_v9 = vrot.slane %v1658_v6, 7  ;;  %v1662_v12 = vrot.slane %v1657_v59, 7  ;;  %v1672_v13 = vrot.slane %v1659_v10, 7  ;;  %v1684_v14 = vrot.slane %v1658_v6, 1 }
 0xf76   :  { %v1687_v5 = vrot.slane %v1659_v10, 1  ;;  %v1683_v19 = vrot.slane %v1657_v59, 1 }
 0xf77   :  { %1674 = vrot.lane.b32.xlu0 %v1663_v9, %s2172_s26  ;;  %v1664_v16 = vsel %vm3234_vm2, %v1662_v12, %v1663_v9  ;;  %v1673_v20 = vsel %vm3235_vm3, %v1663_v9, %v1672_v13  ;;  %v1691_v18 = vsel %vm3237_vm5, %v1684_v14, 0.0  ;;  %vm3249_vm2 = vcmask 519168  }
 0xf78   :  { %v1688_v17 = vsel %vm3236_vm4, %v1684_v14, %v1687_v5  ;;  %v1685_v22 = vsel %vm3239_vm7, %v1683_v19, %v1684_v14  ;;  %v1693_v23 = vsel %vm3240_vm8, %v1687_v5, 0.0 }
 0xf79   :  { %1665 = vrot.lane.b32.xlu1 %v1662_v12, %s2172_s26  ;;  %v1692_v21 = vsel %vm3238_vm6, %v1691_v18, %v1688_v17 }
 0xf7b   :  { %1698 = vrot.lane.b32.xlu0 %v1659_v10, %s2173_s21 }
 0xf7d   :  { %1667 = vrot.lane.b32.xlu1 %v1664_v16, %s2172_s26 }
 0xf7f   :  { %1676 = vrot.lane.b32.xlu0 %v1673_v20, %s2172_s26 }
 0xf81   :  { %1694 = vrot.lane.b32.xlu1 %v1657_v59, %s2173_s21 }
 0xf83   :  { %1707 = vrot.lane.b32.xlu0 %v1692_v21, %s2172_s26 }
 0xf85   :  { %1705 = vrot.lane.b32.xlu1 %v1685_v22, %s2172_s26 }
 0xf87   :  { %1709 = vrot.lane.b32.xlu0 %v1693_v23, %s2172_s26 }
 0xfe7   :  { %v1697_v24 = vpop.permute.xlu1 %1696 }
 0xfe9   :  { %v1675_v25 = vpop.permute.xlu0 %1674 }
 0xfeb   :  { %v1666_v26 = vpop.permute.xlu1 %1665 }
 0xfec   :  { %v1680_v37 = vsel %vm3243_vm13, 0.0, %v1666_v26 }
 0xfed   :  { %v1699_v27 = vpop.permute.xlu0 %1698 }
 0xfef   :  { %v1668_v28 = vpop.permute.xlu1 %1667 }
 0xff0   :  { %v1681_v29 = vsel %vm3241_vm10, %v1668_v28, 0.0 }
 0xff1   :  { %v1677_v30 = vpop.permute.xlu0 %1676  ;;  %v1682_v31 = vsel %vm3242_vm11, %v1681_v29, %v1675_v25 }
 0xff2   :  { %v1715_v35 = vsel %vm1404_vm0, %v1682_v31, %v1697_v24  ;;  %v1716_v46 = vsel %vm1404_vm0, %v1677_v30, %v1699_v27 }
 0xff3   :  { %v1695_v32 = vpop.permute.xlu1 %1694 }
 0xff4   :  { %v1714_v42 = vsel %vm1404_vm0, %v1680_v37, %v1695_v32  ;;  %vm3247_vm0 = vcmask 523264  }
 0xff5   :  { %v1708_v33 = vpop.permute.xlu0 %1707  ;;  %vm3248_vm1 = vmmov %vm3247_vm0 }
 0xff6   :  { %v1719_v41 = vsel %vm1717_vm12, %v1715_v35, %v1708_v33 }
 0xff7   :  { %1861 = vmatmul.mubr.msk.f32.vlgmr.msra.gmra.mxu1 %vm3244_vm14, %v1719_v41  ;;  %v1706_v43 = vpop.permute.xlu1 %1705 }
 0xff8   :  { %v1718_v45 = vsel %vm1717_vm12, %v1714_v42, %v1706_v43  ;;  %1824 = vmatprep.mubr.f32.mxu1 %v2148_v0 }
 0xff9   :  { %v1710_v47 = vpop.permute.xlu0 %1709  ;;  %1860 = vmatmul.mubr.msk.f32.vlgmr.msra.gmra.mxu0 %vm3245_vm15, %v1718_v45 }
 0xffa   :  { %v1720_v48 = vsel %vm1717_vm12, %v1716_v46, %v1710_v47 }
 0xffb   :  { %1862 = vmatmul.mubr.msk.f32.gmra.mxu1 %vm3246_vm9, %v1720_v48 }
0x10b7   :  { %v1820_v49 = vpop.f32.mrf.mxu1 }
0x10b8   :  { %2136 = vtanh.f32 %v1820_v49 }
0x10b9   :  { %v1814_v50 = vpop.f32.mrf.mxu0  ;;  %v1822_v51 = vpop.f32.mrf.mxu1 }
0x10ba   :  { %2138 = vtanh.f32 %v1814_v50 }
0x10bb   :  { %2140 = vtanh.f32 %v1822_v51  ;;  %v1816_v52 = vpop.f32.mrf.mxu0  ;;  %v1826_v53 = vpop.f32.mrf.mxu1 }
0x10bc   :  { %2142 = vtanh.f32 %v1816_v52 }
0x10bd   :  { %2144 = vtanh.f32 %v1826_v53  ;;  %v1828_v54 = vpop.f32.mrf.mxu1 }
0x10be   :  { %2146 = vtanh.f32 %v1828_v54 }
0x10c5   :  { %v2137_v0 = vpop.eup %2136 }
0x10c6   :  { %1839 = vst [vmem:[%s3208_s17 + $0x10] sm:$0xff] %v2137_v0 }
0x10c7   :  { %v2139_v55 = vpop.eup %2138 }
0x10c8   :  { %v2141_v56 = vpop.eup %2140  ;;  %1837 = vst [vmem:[%s3208_s17] sm:$0xff] %v2139_v55 }
0x10c9   :  { %v2143_v60 = vpop.eup %2142  ;;  %1840 = vst.msk [vmem:[%s3208_s17 + $0x18] sm:$0xff] %vm3247_vm0, %v2141_v56 }
0x10ca   :  { %v2145_v61 = vpop.eup %2144  ;;  %1838 = vst.msk [vmem:[%s3208_s17 + $0x8] sm:$0xff] %vm3248_vm1, %v2143_v60 }
0x10cb   :  { %v2147_v38 = vpop.eup %2146  ;;  %1841 = vst [vmem:[%s3208_s17 + $0x20] sm:$0xf] %v2145_v61 }
0x10cc   :  { %1842 = vst.msk [vmem:[%s3208_s17 + $0x28] sm:$0xf] %vm3249_vm2, %v2147_v38 }

</bundles_post_ra>
